<compile_context>
chip_gen: v7x
topology: tpu7x:2x2x1
jax: 0.10.0
libtpu: 0.0.40
codegen_flags: <defaults>
</compile_context>

<pallas_src>
import functools

import jax
import jax.numpy as jnp
from jax.experimental import pallas as pl
from jax.experimental.pallas import tpu as pltpu

EMB = 64            # embedding_dim of the original module
FEAT = 8            # fused input width: [cls(1), reg(4), prob(1), cnt(1), zero-pad(1)]
HID = 4 * EMB       # 256: fused hidden width (concat of the four 64-d embeddings)
OUT_PAD = 8         # predictor output (2) padded to a full sublane group
TB = 512            # batch tile (lane axis), multiple of 128


def uncertainty_kernel(x_ref, w1_ref, b1_ref, w2_ref, b2_ref,
                       wp1_ref, bp1_ref, wp2_ref, bp2_ref, out_ref):
    # x_ref: [FEAT, TB]  (batch on lanes -> lane-dense loads)
    x = x_ref[...]

    # fused first layers of the four feature nets: [HID, FEAT] @ [FEAT, TB]
    h = jnp.dot(w1_ref[...], x, preferred_element_type=jnp.float32) + b1_ref[...]
    h = jnp.maximum(h, 0.0)                                   # [HID, TB]

    # fused (block-diagonal) second layers: [HID, HID] @ [HID, TB]
    h = jnp.dot(w2_ref[...], h, preferred_element_type=jnp.float32) + b2_ref[...]
    h = jnp.maximum(h, 0.0)                                   # [HID, TB]

    # predictor layer 1 (acts on the implicit concat): [EMB, HID] @ [HID, TB]
    h = jnp.dot(wp1_ref[...], h, preferred_element_type=jnp.float32) + bp1_ref[...]
    h = jnp.maximum(h, 0.0)                                   # [EMB, TB]

    # predictor layer 2 (out-dim padded 2 -> 8 so the store is unmasked)
    out_ref[...] = (jnp.dot(wp2_ref[...], h, preferred_element_type=jnp.float32)
                    + bp2_ref[...])                           # [OUT_PAD, TB]


def uncertainty_forward(cls_loss, reg_loss, probs, cnt_loss, fused, *, tb=TB):
    N = cls_loss.shape[0]
    w1t, b1, w2t, b2, wp1t, bp1, wp2t, bp2 = fused

    # Pack the four tiny inputs into one slab and transpose -> lane-dense [FEAT, N_pad].
    x = jnp.concatenate(
        [cls_loss, reg_loss, probs, cnt_loss,
         jnp.zeros((N, FEAT - 7), cls_loss.dtype)], axis=-1)          # [N, 8]
    n_pad = pl.cdiv(N, tb) * tb
    if n_pad != N:
        x = jnp.pad(x, ((0, n_pad - N), (0, 0)))
    xt = x.T                                                          # [FEAT, n_pad]

    grid = (n_pad // tb,)

    def full(shape):
        return pl.BlockSpec(shape, lambda i: (0, 0))   # resident weight slab

    out_t = pl.pallas_call(
        uncertainty_kernel,
        out_shape=jax.ShapeDtypeStruct((OUT_PAD, n_pad), jnp.float32),
        grid=grid,
        in_specs=[
            pl.BlockSpec((FEAT, tb), lambda i: (0, i)),   # fused input slab
            full((HID, FEAT)), full((HID, 1)),            # fused layer 1
            full((HID, HID)), full((HID, 1)),             # fused layer 2 (block diag)
            full((EMB, HID)), full((EMB, 1)),             # predictor layer 1
            full((OUT_PAD, EMB)), full((OUT_PAD, 1)),     # predictor layer 2 (padded)
        ],
        out_specs=pl.BlockSpec((OUT_PAD, tb), lambda i: (0, i)),
        compiler_params=pltpu.CompilerParams(
            dimension_semantics=("parallel",)),
    )(xt, w1t, b1, w2t, b2, wp1t, bp1, wp2t, bp2)

    return out_t[:2, :N].T                                            # [N, 2]


def init_raw_params(key, std=1e-4, bias_std=0.0):
    """Per-net params in [in, out] layout (PyTorch stores [out, in]).
    PyTorch's init is std=1e-4 weights / zero biases; a larger std can be used so the
    numerical check in __main__ is meaningful."""
    ks = jax.random.split(key, 20)

    def lin(kw, kb, fin, fout):
        w = (std * jax.random.normal(kw, (fin, fout))).astype(jnp.float32)
        b = (bias_std * jax.random.normal(kb, (fout,))).astype(jnp.float32)
        return w, b

    w1c, b1c = lin(ks[0], ks[1], 1, EMB);  w2c, b2c = lin(ks[2], ks[3], EMB, EMB)
    w1r, b1r = lin(ks[4], ks[5], 4, EMB);  w2r, b2r = lin(ks[6], ks[7], EMB, EMB)
    w1p, b1p = lin(ks[8], ks[9], 1, EMB);  w2p, b2p = lin(ks[10], ks[11], EMB, EMB)
    w1n, b1n = lin(ks[12], ks[13], 1, EMB); w2n, b2n = lin(ks[14], ks[15], EMB, EMB)
    wp1, bp1 = lin(ks[16], ks[17], 4 * EMB, EMB)
    wp2, bp2 = lin(ks[18], ks[19], EMB, 2)
    return (w1c, b1c, w2c, b2c, w1r, b1r, w2r, b2r,
            w1p, b1p, w2p, b2p, w1n, b1n, w2n, b2n,
            wp1, bp1, wp2, bp2)


def fuse_params(raw):
    """Pack the 20 per-net tensors into 9 kernel slabs (transposed, batch-on-lanes)."""
    (w1c, b1c, w2c, b2c, w1r, b1r, w2r, b2r,
     w1p, b1p, w2p, b2p, w1n, b1n, w2n, b2n,
     wp1, bp1, wp2, bp2) = raw

    # Fused first layer [FEAT, HID]: input column k feeds only its own net's block.
    w1 = jnp.zeros((FEAT, HID), jnp.float32)
    w1 = w1.at[0:1, 0 * EMB:1 * EMB].set(w1c)     # cls   (col 0)
    w1 = w1.at[1:5, 1 * EMB:2 * EMB].set(w1r)     # reg   (cols 1-4)
    w1 = w1.at[5:6, 2 * EMB:3 * EMB].set(w1p)     # prob  (col 5)
    w1 = w1.at[6:7, 3 * EMB:4 * EMB].set(w1n)     # cnt   (col 6); col 7 & row 7 stay 0
    b1 = jnp.concatenate([b1c, b1r, b1p, b1n])    # [HID]

    # Fused second layer: exactly block-diagonal [HID, HID].
    w2 = jnp.zeros((HID, HID), jnp.float32)
    w2 = w2.at[0 * EMB:1 * EMB, 0 * EMB:1 * EMB].set(w2c)
    w2 = w2.at[1 * EMB:2 * EMB, 1 * EMB:2 * EMB].set(w2r)
    w2 = w2.at[2 * EMB:3 * EMB, 2 * EMB:3 * EMB].set(w2p)
    w2 = w2.at[3 * EMB:4 * EMB, 3 * EMB:4 * EMB].set(w2n)
    b2 = jnp.concatenate([b2c, b2r, b2p, b2n])    # [HID]

    # Predictor layer 2: pad out-dim 2 -> OUT_PAD with zeros (lane-dense stores).
    wp2_pad = jnp.zeros((EMB, OUT_PAD), jnp.float32).at[:, :2].set(wp2)
    bp2_pad = jnp.zeros((OUT_PAD,), jnp.float32).at[:2].set(bp2)

    col = lambda b: b[:, None]
    # Store transposed ([out, in]) so the kernel computes W @ x_T (batch on lanes).
    return (w1.T, col(b1), w2.T, col(b2),
            wp1.T, col(bp1), wp2_pad.T, col(bp2_pad))


def reference_forward(cls_loss, reg_loss, probs, cnt_loss, raw):
    """Unfused reference that mirrors the PyTorch module structure."""
    (w1c, b1c, w2c, b2c, w1r, b1r, w2r, b2r,
     w1p, b1p, w2p, b2p, w1n, b1n, w2n, b2n,
     wp1, bp1, wp2, bp2) = raw
    dot = functools.partial(jnp.dot, precision=jax.lax.Precision.HIGHEST)

    def mlp(x, w1, b1, w2, b2):
        h = jnp.maximum(dot(x, w1) + b1, 0.0)
        return jnp.maximum(dot(h, w2) + b2, 0.0)

    hc = mlp(cls_loss, w1c, b1c, w2c, b2c)
    hr = mlp(reg_loss, w1r, b1r, w2r, b2r)
    hp = mlp(probs, w1p, b1p, w2p, b2p)
    hn = mlp(cnt_loss, w1n, b1n, w2n, b2n)
    cat = jnp.concatenate([hc, hr, hp, hn], axis=-1)
    h = jnp.maximum(dot(cat, wp1) + bp1, 0.0)
    return dot(h, wp2) + bp2


if __name__ == "__main__":
    key = jax.random.PRNGKey(0)
    kp, kx = jax.random.split(key)

    # PyTorch's init (std=1e-4, zero bias) drives every output to ~1e-10, which would
    # make the numerical check trivially pass; use larger params so fusion/layout bugs
    # actually show up.  Forward-pass semantics are unchanged.
    raw = init_raw_params(kp, std=0.1, bias_std=0.05)
    fused = fuse_params(raw)

    N = 1024   # 2 grid steps of TB=512 -> both v7x TensorCores get work
    k1, k2, k3, k4 = jax.random.split(kx, 4)
    cls_loss = jax.random.uniform(k1, (N, 1), jnp.float32)
    reg_loss = jax.random.uniform(k2, (N, 4), jnp.float32)
    probs = jax.random.uniform(k3, (N, 1), jnp.float32)
    cnt_loss = jax.random.uniform(k4, (N, 1), jnp.float32)

    out = uncertainty_forward(cls_loss, reg_loss, probs, cnt_loss, fused)
    out = jax.block_until_ready(out)

    ref = reference_forward(cls_loss, reg_loss, probs, cnt_loss, raw)
    assert out.shape == (N, 2)
    err = jnp.max(jnp.abs(out - ref))
    assert jnp.allclose(out, ref, rtol=2e-2, atol=1e-3), f"mismatch vs reference: {err}"

    print("KERNEL_OK")
</pallas_src>

<mosaic_0001>
module attributes {stable_mosaic.version = 11 : i64} {
  func.func @uncertainty_kernel(%arg0: i32, %arg1: memref<8x512xf32, #tpu.memory_space<vmem>>, %arg2: memref<256x8xf32, #tpu.memory_space<vmem>>, %arg3: memref<256x1xf32, #tpu.memory_space<vmem>>, %arg4: memref<256x256xf32, #tpu.memory_space<vmem>>, %arg5: memref<256x1xf32, #tpu.memory_space<vmem>>, %arg6: memref<64x256xf32, #tpu.memory_space<vmem>>, %arg7: memref<64x1xf32, #tpu.memory_space<vmem>>, %arg8: memref<8x64xf32, #tpu.memory_space<vmem>>, %arg9: memref<8x1xf32, #tpu.memory_space<vmem>>, %arg10: memref<8x512xf32, #tpu.memory_space<vmem>>) attributes {dimension_semantics = [#tpu.dimension_semantics<parallel>], iteration_bounds = array<i64: 2>, scalar_prefetch = 0 : i64, scratch_operands = 0 : i64, tpu.core_type = #tpu.core_type<tc>, window_params = [{transform_indices = @transform_0, window_bounds = array<i64: 8, 512>}, {pipeline_mode = #tpu.pipeline_mode<synchronous>, transform_indices = @transform_1, window_bounds = array<i64: 256, 8>}, {pipeline_mode = #tpu.pipeline_mode<synchronous>, transform_indices = @transform_2, window_bounds = array<i64: 256, 1>}, {pipeline_mode = #tpu.pipeline_mode<synchronous>, transform_indices = @transform_3, window_bounds = array<i64: 256, 256>}, {pipeline_mode = #tpu.pipeline_mode<synchronous>, transform_indices = @transform_4, window_bounds = array<i64: 256, 1>}, {pipeline_mode = #tpu.pipeline_mode<synchronous>, transform_indices = @transform_5, window_bounds = array<i64: 64, 256>}, {pipeline_mode = #tpu.pipeline_mode<synchronous>, transform_indices = @transform_6, window_bounds = array<i64: 64, 1>}, {pipeline_mode = #tpu.pipeline_mode<synchronous>, transform_indices = @transform_7, window_bounds = array<i64: 8, 64>}, {pipeline_mode = #tpu.pipeline_mode<synchronous>, transform_indices = @transform_8, window_bounds = array<i64: 8, 1>}, {transform_indices = @transform_9, window_bounds = array<i64: 8, 512>}]} {
    %c0 = arith.constant 0 : index
    %c0_0 = arith.constant 0 : index
    %0 = vector.load %arg1[%c0, %c0_0] : memref<8x512xf32, #tpu.memory_space<vmem>>, vector<8x512xf32>
    %c0_1 = arith.constant 0 : index
    %c0_2 = arith.constant 0 : index
    %1 = vector.load %arg2[%c0_1, %c0_2] : memref<256x8xf32, #tpu.memory_space<vmem>>, vector<256x8xf32>
    %cst = arith.constant dense<0.000000e+00> : vector<256x512xf32>
    %2 = tpu.matmul %1, %0, %cst {dimension_numbers = #tpu.dot_dimension_numbers<[1], [0], [0], [1], [0, 0, 1, 1], [], []>} : vector<256x8xf32>, vector<8x512xf32>, vector<256x512xf32> -> vector<256x512xf32>
    %c0_3 = arith.constant 0 : index
    %c0_4 = arith.constant 0 : index
    %3 = vector.load %arg3[%c0_3, %c0_4] : memref<256x1xf32, #tpu.memory_space<vmem>>, vector<256x1xf32>
    %4 = vector.broadcast %3 : vector<256x1xf32> to vector<256x512xf32>
    %5 = arith.addf %2, %4 : vector<256x512xf32>
    %cst_5 = arith.constant 0.000000e+00 : f32
    %6 = vector.broadcast %cst_5 : f32 to vector<256x512xf32>
    %7 = arith.maximumf %5, %6 : vector<256x512xf32>
    %c0_6 = arith.constant 0 : index
    %c0_7 = arith.constant 0 : index
    %8 = vector.load %arg4[%c0_6, %c0_7] : memref<256x256xf32, #tpu.memory_space<vmem>>, vector<256x256xf32>
    %cst_8 = arith.constant dense<0.000000e+00> : vector<256x512xf32>
    %9 = tpu.matmul %8, %7, %cst_8 {dimension_numbers = #tpu.dot_dimension_numbers<[1], [0], [0], [1], [0, 0, 1, 1], [], []>} : vector<256x256xf32>, vector<256x512xf32>, vector<256x512xf32> -> vector<256x512xf32>
    %c0_9 = arith.constant 0 : index
    %c0_10 = arith.constant 0 : index
    %10 = vector.load %arg5[%c0_9, %c0_10] : memref<256x1xf32, #tpu.memory_space<vmem>>, vector<256x1xf32>
    %11 = vector.broadcast %10 : vector<256x1xf32> to vector<256x512xf32>
    %12 = arith.addf %9, %11 : vector<256x512xf32>
    %cst_11 = arith.constant 0.000000e+00 : f32
    %13 = vector.broadcast %cst_11 : f32 to vector<256x512xf32>
    %14 = arith.maximumf %12, %13 : vector<256x512xf32>
    %c0_12 = arith.constant 0 : index
    %c0_13 = arith.constant 0 : index
    %15 = vector.load %arg6[%c0_12, %c0_13] : memref<64x256xf32, #tpu.memory_space<vmem>>, vector<64x256xf32>
    %cst_14 = arith.constant dense<0.000000e+00> : vector<64x512xf32>
    %16 = tpu.matmul %15, %14, %cst_14 {dimension_numbers = #tpu.dot_dimension_numbers<[1], [0], [0], [1], [0, 0, 1, 1], [], []>} : vector<64x256xf32>, vector<256x512xf32>, vector<64x512xf32> -> vector<64x512xf32>
    %c0_15 = arith.constant 0 : index
    %c0_16 = arith.constant 0 : index
    %17 = vector.load %arg7[%c0_15, %c0_16] : memref<64x1xf32, #tpu.memory_space<vmem>>, vector<64x1xf32>
    %18 = vector.broadcast %17 : vector<64x1xf32> to vector<64x512xf32>
    %19 = arith.addf %16, %18 : vector<64x512xf32>
    %cst_17 = arith.constant 0.000000e+00 : f32
    %20 = vector.broadcast %cst_17 : f32 to vector<64x512xf32>
    %21 = arith.maximumf %19, %20 : vector<64x512xf32>
    %c0_18 = arith.constant 0 : index
    %c0_19 = arith.constant 0 : index
    %22 = vector.load %arg8[%c0_18, %c0_19] : memref<8x64xf32, #tpu.memory_space<vmem>>, vector<8x64xf32>
    %cst_20 = arith.constant dense<0.000000e+00> : vector<8x512xf32>
    %23 = tpu.matmul %22, %21, %cst_20 {dimension_numbers = #tpu.dot_dimension_numbers<[1], [0], [0], [1], [0, 0, 1, 1], [], []>} : vector<8x64xf32>, vector<64x512xf32>, vector<8x512xf32> -> vector<8x512xf32>
    %c0_21 = arith.constant 0 : index
    %c0_22 = arith.constant 0 : index
    %24 = vector.load %arg9[%c0_21, %c0_22] : memref<8x1xf32, #tpu.memory_space<vmem>>, vector<8x1xf32>
    %25 = vector.broadcast %24 : vector<8x1xf32> to vector<8x512xf32>
    %26 = arith.addf %23, %25 : vector<8x512xf32>
    %c0_23 = arith.constant 0 : index
    %c0_24 = arith.constant 0 : index
    %27 = vector.load %arg10[%c0_23, %c0_24] : memref<8x512xf32, #tpu.memory_space<vmem>>, vector<8x512xf32>
    tpu.vector_store %arg10[%c0_23, %c0_24], %26 {strides = array<i32>} : memref<8x512xf32, #tpu.memory_space<vmem>>, vector<8x512xf32>,
    return
  }
  func.func @transform_0(%arg0: i32) -> (i32, i32) {
    %c0_i32 = arith.constant 0 : i32
    %c0_i32_0 = arith.constant 0 : i32
    return %c0_i32, %arg0 : i32, i32
  }
  func.func @transform_1(%arg0: i32) -> (i32, i32) {
    %c0_i32 = arith.constant 0 : i32
    %c0_i32_0 = arith.constant 0 : i32
    %c0_i32_1 = arith.constant 0 : i32
    return %c0_i32, %c0_i32_0 : i32, i32
  }
  func.func @transform_2(%arg0: i32) -> (i32, i32) {
    %c0_i32 = arith.constant 0 : i32
    %c0_i32_0 = arith.constant 0 : i32
    %c0_i32_1 = arith.constant 0 : i32
    return %c0_i32, %c0_i32_0 : i32, i32
  }
  func.func @transform_3(%arg0: i32) -> (i32, i32) {
    %c0_i32 = arith.constant 0 : i32
    %c0_i32_0 = arith.constant 0 : i32
    %c0_i32_1 = arith.constant 0 : i32
    return %c0_i32, %c0_i32_0 : i32, i32
  }
  func.func @transform_4(%arg0: i32) -> (i32, i32) {
    %c0_i32 = arith.constant 0 : i32
    %c0_i32_0 = arith.constant 0 : i32
    %c0_i32_1 = arith.constant 0 : i32
    return %c0_i32, %c0_i32_0 : i32, i32
  }
  func.func @transform_5(%arg0: i32) -> (i32, i32) {
    %c0_i32 = arith.constant 0 : i32
    %c0_i32_0 = arith.constant 0 : i32
    %c0_i32_1 = arith.constant 0 : i32
    return %c0_i32, %c0_i32_0 : i32, i32
  }
  func.func @transform_6(%arg0: i32) -> (i32, i32) {
    %c0_i32 = arith.constant 0 : i32
    %c0_i32_0 = arith.constant 0 : i32
    %c0_i32_1 = arith.constant 0 : i32
    return %c0_i32, %c0_i32_0 : i32, i32
  }
  func.func @transform_7(%arg0: i32) -> (i32, i32) {
    %c0_i32 = arith.constant 0 : i32
    %c0_i32_0 = arith.constant 0 : i32
    %c0_i32_1 = arith.constant 0 : i32
    return %c0_i32, %c0_i32_0 : i32, i32
  }
  func.func @transform_8(%arg0: i32) -> (i32, i32) {
    %c0_i32 = arith.constant 0 : i32
    %c0_i32_0 = arith.constant 0 : i32
    %c0_i32_1 = arith.constant 0 : i32
    return %c0_i32, %c0_i32_0 : i32, i32
  }
  func.func @transform_9(%arg0: i32) -> (i32, i32) {
    %c0_i32 = arith.constant 0 : i32
    %c0_i32_0 = arith.constant 0 : i32
    return %c0_i32, %arg0 : i32, i32
  }
}

</mosaic_0001>

<bundles_post_ra>
// kernel: tpu_custom_call.1
= control target key start
LH: loop header
LB: loop body
LE: loop exit
PB: predicated region body
PF: predicated region fallthrough
CT: control target
= control target key end

     0   :  { %14 = vsyncpa [#allocation3], 0  ;;  %s4066_s0 = inlined_call_operand.vmem [shape: f32[8,1024], index: 0, kind: input, shape index: {}]   ;;  %s4067_s1 = inlined_call_operand.vmem [shape: f32[256,8], index: 1, kind: input, shape index: {}]   ;;  %s4068_s2 = inlined_call_operand.vmem [shape: f32[256,1], index: 2, kind: input, shape index: {}]   ;;  %s4069_s3 = inlined_call_operand.vmem [shape: f32[256,256], index: 3, kind: input, shape index: {}]   ;;  %s4070_s4 = inlined_call_operand.vmem [shape: f32[256,1], index: 4, kind: input, shape index: {}]   ;;  %s4071_s5 = inlined_call_operand.vmem [shape: f32[64,256], index: 5, kind: input, shape index: {}]   ;;  %s4072_s6 = inlined_call_operand.vmem [shape: f32[64,1], index: 6, kind: input, shape index: {}]   ;;  %s4073_s7 = inlined_call_operand.vmem [shape: f32[8,64], index: 7, kind: input, shape index: {}]   ;;  %s4074_s8 = inlined_call_operand.vmem [shape: f32[8,1], index: 8, kind: input, shape index: {}]   ;;  %s4075_s9 = inlined_call_operand.hbm [shape: f32[8,1024], index: 9, kind: output, shape index: {}]  }
   0x1   :  { %16 = vsyncpa [#allocation3 + $0x1], 0  ;;  %s3279_s30 = smov 0   ;;  %s3281_s10 = smov 0  }
   0x2   :  { %s3283_s11 = smov 0   ;;  %s3285_s12 = smov 0  }
   0x3 LB: > { %s3300_s13 = sadd.s32 4294967295, %s3224_s12   ;;  %s2752_s14 = sadd.s32 4294967294, %s3224_s12   ;;  %s3224_s12 = sphi %s3285_s12, %s4081_s12   ;;  %s3220_s11 = sphi %s3283_s11, %s4080_s11   ;;  %s3216_s10 = sphi %s3281_s10, %s4079_s10   ;;  %s3212_s30 = sphi %s3279_s30, %s4078_s30  }
   0x4   : > { %s3304_s15 = sadd.s32 1, %s3224_s12   ;;  %s223_s16 = sadd.s32 1, %s3220_s11 }
   0x5   : > { %s220_s17 = ssub.s32 %s3224_s12, %s3304_s15  ;;  %p233_p0 = scmp.ne.s32.totalorder %s3220_s11, %s3216_s10 }
   0x6   : > { %p221_p1 = scmp.eq.s32.totalorder %s220_s17, 0  ;;  %p234_p2 = scmp.eq.s32.totalorder %s3300_s13, 1 }
   0x7   : > { %p239_p3 = scmp.ne.s32.totalorder %s3216_s10, %s3212_s30  ;;  %p240_p4 = scmp.eq.s32.totalorder %s2752_s14, 1 }
   0x8   : > { %s3315_s18 = scalar_select %p221_p1, %s3220_s11, %s223_s16  }
   0x9   : > { %p3317_p5 = por %p234_p2, %p233_p0  ;;  %p3321_p6 = por %p240_p4, %p239_p3 }
   0xa   : > { %p2755_p7 = scmp.ge.s32.totalorder %s3224_s12, 1  ;;  %p291_p8 = scmp.lt.s32.totalorder %s3224_s12, 3 }
   0xc   : > { %p292_p9 = pnand %p2755_p7, %p291_p8 }
   0xd   : > { %v372_v0 = vld [vmem:[%s4068_s2 + $0x10] sm:$0xff] (!%p292_p9)  ;;  %v370_v1 = vld [vmem:[%s4068_s2] sm:$0xff] (!%p292_p9)  ;;  %s2757_s25 = sshll.u32 (!%p292_p9), %s3300_s13, 2  ;;  %v3226_v2 = vmov (!%p292_p9), 0   ;;  %v373_v3 = vld [vmem:[%s4068_s2 + $0x18] sm:$0xff] (!%p292_p9)  ;;  %v3227_v5 = vmov (!%p292_p9), 0.0  }
   0xe   : > { %295 = sbr.rel (%p292_p9) target bundleno = 1201 (0x4b1), region = 56  ;;  %3161 = vset.pattern.permute.xlu1 (!%p292_p9), %v3226_v2  ;;  %3160 = vset.pattern.permute.xlu0 (!%p292_p9), %v3226_v2  ;;  %p328_p10 = scmp.lt.s32.totalorder (!%p292_p9), %s2757_s25, 7  ;;  %v371_v4 = vld [vmem:[%s4068_s2 + $0x8] sm:$0xff] (!%p292_p9)  ;;  %v374_v7 = vld [vmem:[%s4068_s2 + $0x20] sm:$0xff] (!%p292_p9)  ;;  %vm562_vm0 = vcmask (!%p292_p9), 64512   ;;  %v377_v13 = vld [vmem:[%s4068_s2 + $0x38] sm:$0xff] (!%p292_p9) }
   0xf   : > { %414 = vperm.xlu1 (!%p292_p9), %3161, %v372_v0   ;;  %404 = vperm.xlu0 (!%p292_p9), %3160, %v370_v1   ;;  %v375_v6 = vld [vmem:[%s4068_s2 + $0x28] sm:$0xff] (!%p292_p9)  ;;  %v338_v12 = vld [vmem:[%s4067_s1] sm:$0xff] (!%p292_p9)  ;;  %v376_v14 = vld [vmem:[%s4068_s2 + $0x30] sm:$0xff] (!%p292_p9)  ;;  %vm2528_vm1 = vcmask (!%p292_p9), 523264   ;;  %s2830_s28 = sshll.u32 (!%p292_p9), %s3300_s13, 9  ;;  %s3228_s23 = smov (!%p292_p9), [#allocation2]  }
  0x10   : > { %723 = vmatprep.mubr.f32.mxu0 (!%p292_p9), %v3227_v5  ;;  %980 = vmatprep.mubr.f32.mxu1 (!%p292_p9), %v3227_v5  ;;  %v339_v15 = vld [vmem:[%s4067_s1 + $0x8] sm:$0xff] (!%p292_p9)  ;;  %v378_v17 = vld [vmem:[%s4068_s2 + $0x40] sm:$0xff] (!%p292_p9)  ;;  %v340_v18 = vld [vmem:[%s4067_s1 + $0x10] sm:$0xff] (!%p292_p9)  ;;  %s3166_s24 = sshll.u32 (!%p292_p9), %s3228_s23, 4  ;;  %s3167_s24 = int_to_ptr.vmem [resolvable:$false] %s3166_s24 }
  0x11   : > { %v379_v16 = vld [vmem:[%s4068_s2 + $0x48] sm:$0xff] (!%p292_p9)  ;;  %v381_v19 = vld [vmem:[%s4068_s2 + $0x58] sm:$0xff] (!%p292_p9)  ;;  %v380_v20 = vld [vmem:[%s4068_s2 + $0x50] sm:$0xff] (!%p292_p9)  ;;  %s3168_s26 = scalar_lea.vmem (!%p292_p9), %s3167_s24, 1024 }
  0x12   : > { %v341_v21 = vld [vmem:[%s4067_s1 + $0x18] sm:$0xff] (!%p292_p9)  ;;  %v383_v22 = vld [vmem:[%s4068_s2 + $0x68] sm:$0xff] (!%p292_p9)  ;;  %v382_v23 = vld [vmem:[%s4068_s2 + $0x60] sm:$0xff] (!%p292_p9) }
  0x13   : > { %419 = vperm.xlu1 (!%p292_p9), %3161, %v373_v3   ;;  %409 = vperm.xlu0 (!%p292_p9), %3160, %v371_v4   ;;  %v342_v24 = vld [vmem:[%s4067_s1 + $0x20] sm:$0xff] (!%p292_p9)  ;;  %v385_v25 = vld [vmem:[%s4068_s2 + $0x78] sm:$0xff] (!%p292_p9)  ;;  %v384_v26 = vld [vmem:[%s4068_s2 + $0x70] sm:$0xff] (!%p292_p9) }
  0x14   : > { %v343_v27 = vld [vmem:[%s4067_s1 + $0x28] sm:$0xff] (!%p292_p9)  ;;  %v386_v29 = vld [vmem:[%s4068_s2 + $0x80] sm:$0xff] (!%p292_p9)  ;;  %v344_v30 = vld [vmem:[%s4067_s1 + $0x30] sm:$0xff] (!%p292_p9) }
  0x15   : > { %s4083_s25 = smov (!%p328_p10, %s2757_s25), 7  ;;  %v387_v28 = vld [vmem:[%s4068_s2 + $0x88] sm:$0xff]  ;;  %v389_v31 = vld [vmem:[%s4068_s2 + $0x98] sm:$0xff]  ;;  %v388_v32 = vld [vmem:[%s4068_s2 + $0x90] sm:$0xff] }
  0x16   : > { %s2758_s14 = sshll.u32 %s4083_s25, 3  ;;  %v345_v33 = vld [vmem:[%s4067_s1 + $0x38] sm:$0xff]  ;;  %v391_v34 = vld [vmem:[%s4068_s2 + $0xa8] sm:$0xff]  ;;  %v390_v35 = vld [vmem:[%s4068_s2 + $0xa0] sm:$0xff]  ;;  %s324_s25 = sand.u32 1, %s3216_s10  }
  0x17   : > { %s331_s21 = scalar_lea.vmem %s4066_s0, %s2758_s14  ;;  %429 = vperm.xlu1 %3161, %v375_v6   ;;  %424 = vperm.xlu0 %3160, %v374_v7   ;;  %v346_v36 = vld [vmem:[%s4067_s1 + $0x40] sm:$0xff]  ;;  %v393_v37 = vld [vmem:[%s4068_s2 + $0xb8] sm:$0xff]  ;;  %v392_v38 = vld [vmem:[%s4068_s2 + $0xb0] sm:$0xff]  ;;  %s2756_s27 = sshll.u32 %s324_s25, 5 }
  0x18   : > { %v335_v8 = vld [vmem:[%s331_s21 + $0x8] sm:$0xff]  ;;  %v337_v9 = vld [vmem:[%s331_s21 + $0x18] sm:$0xff]  ;;  %v334_v10 = vld [vmem:[%s331_s21] sm:$0xff]  ;;  %s326_s29 = scalar_lea.vmem [#allocation2], %s2756_s27  ;;  %s2679_s13 = scalar_lea.sflag [#allocation3], %s324_s25 }
  0x19   : > { %659 = vmatprep.subr.mxu0 %v335_v8  ;;  %916 = vmatprep.subr.mxu1 %v337_v9  ;;  %v336_v11 = vld [vmem:[%s331_s21 + $0x10] sm:$0xff]  ;;  %v347_v39 = vld [vmem:[%s4067_s1 + $0x48] sm:$0xff]  ;;  %v394_v41 = vld [vmem:[%s4068_s2 + $0xc0] sm:$0xff]  ;;  %s2693_s14 = sshll.u32 %s326_s29, 4  ;;  %s4024_s21 = scalar_lea.hbm %s4075_s9, %s2830_s28  ;;  %s4026_s14 = int_to_ptr.vmem [resolvable:$true] %s2693_s14 }
  0x1a   : > { %660 = vmatpush1.msra.mxu0 %v334_v10  ;;  %917 = vmatpush1.msra.mxu1 %v336_v11  ;;  %v395_v40 = vld [vmem:[%s4068_s2 + $0xc8] sm:$0xff]  ;;  %v348_v42 = vld [vmem:[%s4067_s1 + $0x50] sm:$0xff]  ;;  %v397_v43 = vld [vmem:[%s4068_s2 + $0xd8] sm:$0xff]  ;;  %s3162_s22 = scalar_lea.vmem %s4026_s14, 512  ;;  %p3169_p0 = scmp.lt.s32.totalorder %s4026_s14, %s3167_s24 }
  0x1b   : > { %2759 = vmatmul.mubr.msk.f32.vlgmr.msra.gmra.mrb[0].mxu0 %vm562_vm0, %v338_v12  ;;  %2791 = vmatmul.mubr.msk.f32.vlgmr.msra.gmra.mrb[0].mxu1 %vm562_vm0, %v338_v12  ;;  %v396_v44 = vld [vmem:[%s4068_s2 + $0xd0] sm:$0xff]  ;;  %v349_v45 = vld [vmem:[%s4067_s1 + $0x58] sm:$0xff]  ;;  %v399_v46 = vld [vmem:[%s4068_s2 + $0xe8] sm:$0xff]  ;;  %p3163_p11 = scmp.ne.s32.totalorder %s4026_s14, %s3162_s22  ;;  %p3170_p1 = scmp.lt.s32.totalorder %s3168_s26, %s3162_s22 }
  0x1c   : > { %729 = vmatprep.mubr.f32.mxu0 %v3227_v5  ;;  %986 = vmatprep.mubr.f32.mxu1 %v3227_v5  ;;  %v398_v47 = vld [vmem:[%s4068_s2 + $0xe0] sm:$0xff]  ;;  %v401_v49 = vld [vmem:[%s4068_s2 + $0xf8] sm:$0xff]  ;;  %v400_v50 = vld [vmem:[%s4068_s2 + $0xf0] sm:$0xff] }
  0x1d   : > { %439 = vperm.xlu1 %3161, %v377_v13   ;;  %434 = vperm.xlu0 %3160, %v376_v14   ;;  %v350_v48 = vld [vmem:[%s4067_s1 + $0x60] sm:$0xff]  ;;  %v351_v51 = vld [vmem:[%s4067_s1 + $0x68] sm:$0xff]  ;;  %v352_v54 = vld [vmem:[%s4067_s1 + $0x70] sm:$0xff]  ;;  %p3164_p12 = pnand %p3163_p11, %p3317_p5  ;;  %p3171_p2 = por %p3170_p1, %p3169_p0 }
  0x1e   : > { %v1366_v52 = vld [vmem:[%s4070_s4 + $0x8] sm:$0xff]  ;;  %v1365_v53 = vld [vmem:[%s4070_s4] sm:$0xff]  ;;  %v1368_v55 = vld [vmem:[%s4070_s4 + $0x18] sm:$0xff] }
  0x1f   : > { %2760 = vmatmul.mubr.msk.f32.gmra.mrb[2].mxu0 %vm562_vm0, %v339_v15  ;;  %2792 = vmatmul.mubr.msk.f32.gmra.mrb[2].mxu1 %vm562_vm0, %v339_v15  ;;  %v1367_v56 = vld [vmem:[%s4070_s4 + $0x10] sm:$0xff]  ;;  %v353_v57 = vld [vmem:[%s4067_s1 + $0x78] sm:$0xff]  ;;  %v1370_v58 = vld [vmem:[%s4070_s4 + $0x28] sm:$0xff]  ;;  %p3165_p13 = pneg %p3164_p12 }
  0x20   : > { %735 = vmatprep.mubr.f32.mxu0 %v3227_v5  ;;  %992 = vmatprep.mubr.f32.mxu1 %v3227_v5  ;;  %v1369_v59 = vld [vmem:[%s4070_s4 + $0x20] sm:$0xff]  ;;  %v1372_v61 = vld [vmem:[%s4070_s4 + $0x38] sm:$0xff]  ;;  %v1371_v62 = vld [vmem:[%s4070_s4 + $0x30] sm:$0xff] }
  0x21   : > { %449 = vperm.xlu1 %3161, %v379_v16   ;;  %444 = vperm.xlu0 %3160, %v378_v17   ;;  %v354_v60 = vld [vmem:[%s4067_s1 + $0x80] sm:$0xff]  ;;  %v355_v63 = vld [vmem:[%s4067_s1 + $0x88] sm:$0xff]  ;;  %v356_v2 = vld [vmem:[%s4067_s1 + $0x90] sm:$0xff]  ;;  %p3172_p3 = pnand %p3171_p2, %p3165_p13 }
  0x22   : > { %v1374_v0 = vld [vmem:[%s4070_s4 + $0x48] sm:$0xff]  ;;  %v1373_v1 = vld [vmem:[%s4070_s4 + $0x40] sm:$0xff]  ;;  %v1376_v3 = vld [vmem:[%s4070_s4 + $0x58] sm:$0xff] }
  0x23   : > { %2761 = vmatmul.mubr.msk.f32.gmra.mrb[4].mxu0 %vm562_vm0, %v340_v18  ;;  %2793 = vmatmul.mubr.msk.f32.gmra.mrb[4].mxu1 %vm562_vm0, %v340_v18  ;;  %v1375_v4 = vld [vmem:[%s4070_s4 + $0x50] sm:$0xff]  ;;  %v357_v6 = vld [vmem:[%s4067_s1 + $0x98] sm:$0xff]  ;;  %v1378_v7 = vld [vmem:[%s4070_s4 + $0x68] sm:$0xff] }
  0x24   : > { %741 = vmatprep.mubr.f32.mxu0 %v3227_v5  ;;  %998 = vmatprep.mubr.f32.mxu1 %v3227_v5  ;;  %v1377_v8 = vld [vmem:[%s4070_s4 + $0x60] sm:$0xff]  ;;  %v1380_v10 = vld [vmem:[%s4070_s4 + $0x78] sm:$0xff]  ;;  %v1379_v11 = vld [vmem:[%s4070_s4 + $0x70] sm:$0xff] }
  0x25   : > { %459 = vperm.xlu1 %3161, %v381_v19   ;;  %454 = vperm.xlu0 %3160, %v380_v20   ;;  %v358_v9 = vld [vmem:[%s4067_s1 + $0xa0] sm:$0xff]  ;;  %v359_v12 = vld [vmem:[%s4067_s1 + $0xa8] sm:$0xff]  ;;  %v360_v15 = vld [vmem:[%s4067_s1 + $0xb0] sm:$0xff] }
  0x26   : > { %v1382_v13 = vld [vmem:[%s4070_s4 + $0x88] sm:$0xff]  ;;  %v1381_v14 = vld [vmem:[%s4070_s4 + $0x80] sm:$0xff]  ;;  %v1384_v16 = vld [vmem:[%s4070_s4 + $0x98] sm:$0xff] }
  0x27   : > { %2762 = vmatmul.mubr.msk.f32.gmra.mrb[6].mxu0 %vm562_vm0, %v341_v21  ;;  %2794 = vmatmul.mubr.msk.f32.gmra.mrb[6].mxu1 %vm562_vm0, %v341_v21  ;;  %v1383_v17 = vld [vmem:[%s4070_s4 + $0x90] sm:$0xff]  ;;  %v361_v18 = vld [vmem:[%s4067_s1 + $0xb8] sm:$0xff]  ;;  %v1386_v19 = vld [vmem:[%s4070_s4 + $0xa8] sm:$0xff] }
  0x28   : > { %747 = vmatprep.mubr.f32.mxu0 %v3227_v5  ;;  %1004 = vmatprep.mubr.f32.mxu1 %v3227_v5  ;;  %v1385_v20 = vld [vmem:[%s4070_s4 + $0xa0] sm:$0xff] }
  0x29   : > { %469 = vperm.xlu1 %3161, %v383_v22   ;;  %464 = vperm.xlu0 %3160, %v382_v23   ;;  %v362_v21 = vld [vmem:[%s4067_s1 + $0xc0] sm:$0xff]  ;;  %v1388_v22 = vld [vmem:[%s4070_s4 + $0xb8] sm:$0xff]  ;;  %v1387_v23 = vld [vmem:[%s4070_s4 + $0xb0] sm:$0xff] }
  0x2b   : > { %2763 = vmatmul.mubr.msk.f32.gmra.mrb[8].mxu0 %vm562_vm0, %v342_v24  ;;  %2795 = vmatmul.mubr.msk.f32.gmra.mrb[8].mxu1 %vm562_vm0, %v342_v24  ;;  %v363_v24 = vld [vmem:[%s4067_s1 + $0xc8] sm:$0xff] }
  0x2c   : > { %753 = vmatprep.mubr.f32.mxu0 %v3227_v5  ;;  %1010 = vmatprep.mubr.f32.mxu1 %v3227_v5 }
  0x2d   : > { %479 = vperm.xlu1 %3161, %v385_v25   ;;  %474 = vperm.xlu0 %3160, %v384_v26   ;;  %v1390_v25 = vld [vmem:[%s4070_s4 + $0xc8] sm:$0xff]  ;;  %v1389_v26 = vld [vmem:[%s4070_s4 + $0xc0] sm:$0xff] }
  0x2f   : > { %2764 = vmatmul.mubr.msk.f32.gmra.mrb[10].mxu0 %vm562_vm0, %v343_v27  ;;  %2796 = vmatmul.mubr.msk.f32.gmra.mrb[10].mxu1 %vm562_vm0, %v343_v27  ;;  %v364_v27 = vld [vmem:[%s4067_s1 + $0xd0] sm:$0xff] }
  0x30   : > { %759 = vmatprep.mubr.f32.mxu0 %v3227_v5  ;;  %1016 = vmatprep.mubr.f32.mxu1 %v3227_v5 }
  0x31   : > { %489 = vperm.xlu1 %3161, %v387_v28   ;;  %484 = vperm.xlu0 %3160, %v386_v29   ;;  %v1392_v28 = vld [vmem:[%s4070_s4 + $0xd8] sm:$0xff]  ;;  %v1391_v29 = vld [vmem:[%s4070_s4 + $0xd0] sm:$0xff] }
  0x33   : > { %2765 = vmatmul.mubr.msk.f32.gmra.mrb[12].mxu0 %vm562_vm0, %v344_v30  ;;  %2797 = vmatmul.mubr.msk.f32.gmra.mrb[12].mxu1 %vm562_vm0, %v344_v30  ;;  %v365_v30 = vld [vmem:[%s4067_s1 + $0xd8] sm:$0xff] }
  0x34   : > { %765 = vmatprep.mubr.f32.mxu0 %v3227_v5  ;;  %1022 = vmatprep.mubr.f32.mxu1 %v3227_v5 }
  0x35   : > { %499 = vperm.xlu1 %3161, %v389_v31   ;;  %494 = vperm.xlu0 %3160, %v388_v32   ;;  %v1394_v31 = vld [vmem:[%s4070_s4 + $0xe8] sm:$0xff]  ;;  %v1393_v32 = vld [vmem:[%s4070_s4 + $0xe0] sm:$0xff] }
  0x37   : > { %2766 = vmatmul.mubr.msk.f32.gmra.mrb[14].mxu0 %vm562_vm0, %v345_v33  ;;  %2798 = vmatmul.mubr.msk.f32.gmra.mrb[14].mxu1 %vm562_vm0, %v345_v33  ;;  %v366_v33 = vld [vmem:[%s4067_s1 + $0xe0] sm:$0xff] }
  0x38   : > { %771 = vmatprep.mubr.f32.mxu0 %v3227_v5  ;;  %1028 = vmatprep.mubr.f32.mxu1 %v3227_v5 }
  0x39   : > { %509 = vperm.xlu1 %3161, %v391_v34   ;;  %504 = vperm.xlu0 %3160, %v390_v35   ;;  %v1396_v34 = vld [vmem:[%s4070_s4 + $0xf8] sm:$0xff]  ;;  %v1395_v35 = vld [vmem:[%s4070_s4 + $0xf0] sm:$0xff] }
  0x3b   : > { %2767 = vmatmul.mubr.msk.f32.gmra.mrb[16].mxu0 %vm562_vm0, %v346_v36  ;;  %2799 = vmatmul.mubr.msk.f32.gmra.mrb[16].mxu1 %vm562_vm0, %v346_v36  ;;  %v367_v36 = vld [vmem:[%s4067_s1 + $0xe8] sm:$0xff] }
  0x3c   : > { %777 = vmatprep.mubr.f32.mxu0 %v3227_v5  ;;  %1034 = vmatprep.mubr.f32.mxu1 %v3227_v5 }
  0x3d   : > { %519 = vperm.xlu1 %3161, %v393_v37   ;;  %514 = vperm.xlu0 %3160, %v392_v38   ;;  %v2216_v37 = vld [vmem:[%s4072_s6 + $0x8] sm:$0xff]  ;;  %v2215_v38 = vld [vmem:[%s4072_s6] sm:$0xff] }
  0x3f   : > { %2768 = vmatmul.mubr.msk.f32.gmra.mrb[18].mxu0 %vm562_vm0, %v347_v39  ;;  %2800 = vmatmul.mubr.msk.f32.gmra.mrb[18].mxu1 %vm562_vm0, %v347_v39  ;;  %v368_v39 = vld [vmem:[%s4067_s1 + $0xf0] sm:$0xff] }
  0x40   : > { %783 = vmatprep.mubr.f32.mxu0 %v3227_v5  ;;  %1040 = vmatprep.mubr.f32.mxu1 %v3227_v5 }
  0x41   : > { %529 = vperm.xlu1 %3161, %v395_v40   ;;  %524 = vperm.xlu0 %3160, %v394_v41   ;;  %v2218_v40 = vld [vmem:[%s4072_s6 + $0x18] sm:$0xff]  ;;  %v2217_v41 = vld [vmem:[%s4072_s6 + $0x10] sm:$0xff] }
  0x43   : > { %2769 = vmatmul.mubr.msk.f32.gmra.mrb[20].mxu0 %vm562_vm0, %v348_v42  ;;  %2801 = vmatmul.mubr.msk.f32.gmra.mrb[20].mxu1 %vm562_vm0, %v348_v42  ;;  %v369_v42 = vld [vmem:[%s4067_s1 + $0xf8] sm:$0xff] }
  0x44   : > { %789 = vmatprep.mubr.f32.mxu0 %v3227_v5  ;;  %1046 = vmatprep.mubr.f32.mxu1 %v3227_v5 }
  0x45   : > { %539 = vperm.xlu1 %3161, %v397_v43   ;;  %534 = vperm.xlu0 %3160, %v396_v44   ;;  %v2220_v43 = vld [vmem:[%s4072_s6 + $0x28] sm:$0xff]  ;;  %v2219_v44 = vld [vmem:[%s4072_s6 + $0x20] sm:$0xff] }
  0x47   : > { %2770 = vmatmul.mubr.msk.f32.gmra.mrb[22].mxu0 %vm562_vm0, %v349_v45  ;;  %2802 = vmatmul.mubr.msk.f32.gmra.mrb[22].mxu1 %vm562_vm0, %v349_v45  ;;  %v2222_v45 = vld [vmem:[%s4072_s6 + $0x38] sm:$0xff] }
  0x48   : > { %795 = vmatprep.mubr.f32.mxu0 %v3227_v5  ;;  %1052 = vmatprep.mubr.f32.mxu1 %v3227_v5 }
  0x49   : > { %549 = vperm.xlu1 %3161, %v399_v46   ;;  %544 = vperm.xlu0 %3160, %v398_v47   ;;  %v2221_v46 = vld [vmem:[%s4072_s6 + $0x30] sm:$0xff]  ;;  %v2522_v47 = vld [vmem:[%s4074_s8] sm:$0xff] }
  0x4b   : > { %2771 = vmatmul.mubr.msk.f32.gmra.mrb[24].mxu0 %vm562_vm0, %v350_v48  ;;  %2803 = vmatmul.mubr.msk.f32.gmra.mrb[24].mxu1 %vm562_vm0, %v350_v48 }
  0x4c   : > { %801 = vmatprep.mubr.f32.mxu0 %v3227_v5  ;;  %1058 = vmatprep.mubr.f32.mxu1 %v3227_v5 }
  0x4d   : > { %559 = vperm.xlu1 %3161, %v401_v49   ;;  %554 = vperm.xlu0 %3160, %v400_v50  }
  0x4f   : > { %2772 = vmatmul.mubr.msk.f32.gmra.mrb[26].mxu0 %vm562_vm0, %v351_v51  ;;  %2804 = vmatmul.mubr.msk.f32.gmra.mrb[26].mxu1 %vm562_vm0, %v351_v51 }
  0x50   : > { %807 = vmatprep.mubr.f32.mxu0 %v3227_v5  ;;  %1064 = vmatprep.mubr.f32.mxu1 %v3227_v5 }
  0x51   : > { %1404 = vperm.xlu1 %3161, %v1366_v52   ;;  %1399 = vperm.xlu0 %3160, %v1365_v53  }
  0x53   : > { %2773 = vmatmul.mubr.msk.f32.gmra.mrb[28].mxu0 %vm562_vm0, %v352_v54  ;;  %2805 = vmatmul.mubr.msk.f32.gmra.mrb[28].mxu1 %vm562_vm0, %v352_v54 }
  0x54   : > { %813 = vmatprep.mubr.f32.mxu0 %v3227_v5  ;;  %1070 = vmatprep.mubr.f32.mxu1 %v3227_v5 }
  0x55   : > { %1414 = vperm.xlu1 %3161, %v1368_v55   ;;  %1409 = vperm.xlu0 %3160, %v1367_v56  }
  0x57   : > { %2774 = vmatmul.mubr.msk.f32.gmra.mrb[30].mxu0 %vm562_vm0, %v353_v57  ;;  %2806 = vmatmul.mubr.msk.f32.gmra.mrb[30].mxu1 %vm562_vm0, %v353_v57 }
  0x58   : > { %819 = vmatprep.mubr.f32.mxu0 %v3227_v5  ;;  %1076 = vmatprep.mubr.f32.mxu1 %v3227_v5 }
  0x59   : > { %1424 = vperm.xlu1 %3161, %v1370_v58   ;;  %1419 = vperm.xlu0 %3160, %v1369_v59  }
  0x5b   : > { %2775 = vmatmul.mubr.msk.f32.gmra.mrb[32].mxu0 %vm562_vm0, %v354_v60  ;;  %2807 = vmatmul.mubr.msk.f32.gmra.mrb[32].mxu1 %vm562_vm0, %v354_v60 }
  0x5c   : > { %825 = vmatprep.mubr.f32.mxu0 %v3227_v5  ;;  %1082 = vmatprep.mubr.f32.mxu1 %v3227_v5 }
  0x5d   : > { %1434 = vperm.xlu1 %3161, %v1372_v61   ;;  %1429 = vperm.xlu0 %3160, %v1371_v62  }
  0x5f   : > { %2776 = vmatmul.mubr.msk.f32.gmra.mrb[34].mxu0 %vm562_vm0, %v355_v63  ;;  %2808 = vmatmul.mubr.msk.f32.gmra.mrb[34].mxu1 %vm562_vm0, %v355_v63 }
  0x60   : > { %831 = vmatprep.mubr.f32.mxu0 %v3227_v5  ;;  %1088 = vmatprep.mubr.f32.mxu1 %v3227_v5 }
  0x61   : > { %1444 = vperm.xlu1 %3161, %v1374_v0   ;;  %1439 = vperm.xlu0 %3160, %v1373_v1   ;;  %v1302_v1 = vld [vmem:[%s4069_s3 + $0x8] sm:$0xff] }
  0x63   : > { %2777 = vmatmul.mubr.msk.f32.gmra.mrb[36].mxu0 %vm562_vm0, %v356_v2  ;;  %2809 = vmatmul.mubr.msk.f32.gmra.mrb[36].mxu1 %vm562_vm0, %v356_v2 }
  0x64   : > { %837 = vmatprep.mubr.f32.mxu0 %v3227_v5  ;;  %1094 = vmatprep.mubr.f32.mxu1 %v3227_v5 }
  0x65   : > { %1454 = vperm.xlu1 %3161, %v1376_v3   ;;  %1449 = vperm.xlu0 %3160, %v1375_v4  }
  0x67   : > { %2778 = vmatmul.mubr.msk.f32.gmra.mrb[38].mxu0 %vm562_vm0, %v357_v6  ;;  %2810 = vmatmul.mubr.msk.f32.gmra.mrb[38].mxu1 %vm562_vm0, %v357_v6 }
  0x68   : > { %843 = vmatprep.mubr.f32.mxu0 %v3227_v5  ;;  %1100 = vmatprep.mubr.f32.mxu1 %v3227_v5 }
  0x69   : > { %1464 = vperm.xlu1 %3161, %v1378_v7   ;;  %1459 = vperm.xlu0 %3160, %v1377_v8  }
  0x6b   : > { %2779 = vmatmul.mubr.msk.f32.gmra.mrb[40].mxu0 %vm562_vm0, %v358_v9  ;;  %2811 = vmatmul.mubr.msk.f32.gmra.mrb[40].mxu1 %vm562_vm0, %v358_v9 }
  0x6c   : > { %849 = vmatprep.mubr.f32.mxu0 %v3227_v5  ;;  %1106 = vmatprep.mubr.f32.mxu1 %v3227_v5 }
  0x6d   : > { %1474 = vperm.xlu1 %3161, %v1380_v10   ;;  %1469 = vperm.xlu0 %3160, %v1379_v11  }
  0x6f   : > { %2780 = vmatmul.mubr.msk.f32.gmra.mrb[42].mxu0 %vm562_vm0, %v359_v12  ;;  %2812 = vmatmul.mubr.msk.f32.gmra.mrb[42].mxu1 %vm562_vm0, %v359_v12 }
  0x70   : > { %855 = vmatprep.mubr.f32.mxu0 %v3227_v5  ;;  %1112 = vmatprep.mubr.f32.mxu1 %v3227_v5 }
  0x71   : > { %1484 = vperm.xlu1 %3161, %v1382_v13   ;;  %1479 = vperm.xlu0 %3160, %v1381_v14  }
  0x73   : > { %2781 = vmatmul.mubr.msk.f32.gmra.mrb[44].mxu0 %vm562_vm0, %v360_v15  ;;  %2813 = vmatmul.mubr.msk.f32.gmra.mrb[44].mxu1 %vm562_vm0, %v360_v15 }
  0x74   : > { %861 = vmatprep.mubr.f32.mxu0 %v3227_v5  ;;  %1118 = vmatprep.mubr.f32.mxu1 %v3227_v5 }
  0x75   : > { %1494 = vperm.xlu1 %3161, %v1384_v16   ;;  %1489 = vperm.xlu0 %3160, %v1383_v17  }
  0x77   : > { %2782 = vmatmul.mubr.msk.f32.gmra.mrb[46].mxu0 %vm562_vm0, %v361_v18  ;;  %2814 = vmatmul.mubr.msk.f32.gmra.mrb[46].mxu1 %vm562_vm0, %v361_v18 }
  0x78   : > { %867 = vmatprep.mubr.f32.mxu0 %v3227_v5  ;;  %1124 = vmatprep.mubr.f32.mxu1 %v3227_v5 }
  0x79   : > { %1504 = vperm.xlu1 %3161, %v1386_v19   ;;  %1499 = vperm.xlu0 %3160, %v1385_v20  }
  0x7b   : > { %2783 = vmatmul.mubr.msk.f32.gmra.mrb[48].mxu0 %vm562_vm0, %v362_v21  ;;  %2815 = vmatmul.mubr.msk.f32.gmra.mrb[48].mxu1 %vm562_vm0, %v362_v21 }
  0x7c   : > { %873 = vmatprep.mubr.f32.mxu0 %v3227_v5  ;;  %1130 = vmatprep.mubr.f32.mxu1 %v3227_v5 }
  0x7d   : > { %1514 = vperm.xlu1 %3161, %v1388_v22   ;;  %1509 = vperm.xlu0 %3160, %v1387_v23  }
  0x7f   : > { %2784 = vmatmul.mubr.msk.f32.gmra.mrb[50].mxu0 %vm562_vm0, %v363_v24  ;;  %2816 = vmatmul.mubr.msk.f32.gmra.mrb[50].mxu1 %vm562_vm0, %v363_v24 }
  0x80   : > { %879 = vmatprep.mubr.f32.mxu0 %v3227_v5  ;;  %1136 = vmatprep.mubr.f32.mxu1 %v3227_v5 }
  0x81   : > { %1524 = vperm.xlu1 %3161, %v1390_v25   ;;  %1519 = vperm.xlu0 %3160, %v1389_v26  }
  0x83   : > { %2785 = vmatmul.mubr.msk.f32.gmra.mrb[52].mxu0 %vm562_vm0, %v364_v27  ;;  %2817 = vmatmul.mubr.msk.f32.gmra.mrb[52].mxu1 %vm562_vm0, %v364_v27 }
  0x84   : > { %885 = vmatprep.mubr.f32.mxu0 %v3227_v5  ;;  %1142 = vmatprep.mubr.f32.mxu1 %v3227_v5 }
  0x85   : > { %1534 = vperm.xlu1 %3161, %v1392_v28   ;;  %1529 = vperm.xlu0 %3160, %v1391_v29  }
  0x87   : > { %2786 = vmatmul.mubr.msk.f32.gmra.mrb[54].mxu0 %vm562_vm0, %v365_v30  ;;  %2818 = vmatmul.mubr.msk.f32.gmra.mrb[54].mxu1 %vm562_vm0, %v365_v30 }
  0x88   : > { %891 = vmatprep.mubr.f32.mxu0 %v3227_v5  ;;  %1148 = vmatprep.mubr.f32.mxu1 %v3227_v5 }
  0x89   : > { %1544 = vperm.xlu1 %3161, %v1394_v31   ;;  %1539 = vperm.xlu0 %3160, %v1393_v32  }
  0x8b   : > { %2787 = vmatmul.mubr.msk.f32.gmra.mrb[56].mxu0 %vm562_vm0, %v366_v33  ;;  %2819 = vmatmul.mubr.msk.f32.gmra.mrb[56].mxu1 %vm562_vm0, %v366_v33 }
  0x8c   : > { %897 = vmatprep.mubr.f32.mxu0 %v3227_v5  ;;  %1154 = vmatprep.mubr.f32.mxu1 %v3227_v5 }
  0x8d   : > { %1554 = vperm.xlu1 %3161, %v1396_v34   ;;  %1549 = vperm.xlu0 %3160, %v1395_v35  }
  0x8e   : > { %v405_v48 = vpop.permute.xlu0 %404  ;;  %v415_v53 = vpop.permute.xlu1 %414 }
  0x8f   : > { %2788 = vmatmul.mubr.msk.f32.gmra.mrb[58].mxu0 %vm562_vm0, %v367_v36  ;;  %2820 = vmatmul.mubr.msk.f32.gmra.mrb[58].mxu1 %vm562_vm0, %v367_v36 }
  0x90   : > { %903 = vmatprep.mubr.f32.mxu0 %v3227_v5  ;;  %1160 = vmatprep.mubr.f32.mxu1 %v3227_v5 }
  0x91   : > { %2230 = vperm.xlu1 %3161, %v2216_v37   ;;  %2225 = vperm.xlu0 %3160, %v2215_v38  }
  0x92   : > { %v410_v54 = vpop.permute.xlu0 %409  ;;  %v420_v21 = vpop.permute.xlu1 %419 }
  0x93   : > { %2789 = vmatmul.mubr.msk.f32.gmra.mrb[60].mxu0 %vm562_vm0, %v368_v39  ;;  %2821 = vmatmul.mubr.msk.f32.gmra.mrb[60].mxu1 %vm562_vm0, %v368_v39 }
  0x94   : > { %909 = vmatprep.mubr.f32.mxu0 %v3227_v5  ;;  %1166 = vmatprep.mubr.f32.mxu1 %v3227_v5 }
  0x95   : > { %2240 = vperm.xlu1 %3161, %v2218_v40   ;;  %2235 = vperm.xlu0 %3160, %v2217_v41  }
  0x97   : > { %2790 = vmatmul.mubr.msk.f32.gmra.mrb[62].mxu0 %vm562_vm0, %v369_v42  ;;  %2822 = vmatmul.mubr.msk.f32.gmra.mrb[62].mxu1 %vm562_vm0, %v369_v42 }
  0x98   : > { %1621 = vmatprep.mubr.f32.mxu0 %v1302_v1  ;;  %1878 = vmatprep.mubr.f32.mxu1 %v1302_v1 }
  0x99   : > { %2250 = vperm.xlu1 %3161, %v2220_v43   ;;  %2245 = vperm.xlu0 %3160, %v2219_v44  }
  0x9d   : > { %2260 = vperm.xlu1 %3161, %v2222_v45   ;;  %2255 = vperm.xlu0 %3160, %v2221_v46  }
  0xa1   : > { %2525 = vperm.xlu0 %3160, %v2522_v47  }
  0xee   : > { %v725_v49 = vpop.f32.mrb[0].mxu0  ;;  %v982_v50 = vpop.f32.mrb[0].mxu1 }
  0xef   : > { %v727_v51 = vpop.f32.mrb[1].mxu0  ;;  %v984_v52 = vpop.f32.mrb[1].mxu1  ;;  %v726_v55 = vadd.f32 %v725_v49, %v405_v48  ;;  %v983_v56 = vadd.f32 %v982_v50, %v405_v48 }
  0xf0   : > { %v728_v57 = vadd.f32 %v727_v51, %v405_v48  ;;  %v985_v58 = vadd.f32 %v984_v52, %v405_v48  ;;  %v425_v48 = vpop.permute.xlu0 %424  ;;  %v430_v51 = vpop.permute.xlu1 %429 }
  0xf1   : > { %v1173_v4 = vmax.f32 %v726_v55, 0.0  ;;  %v1175_v6 = vmax.f32 %v983_v56, 0.0 }
  0xf2   : > { %v731_v59 = vpop.f32.mrb[2].mxu0  ;;  %v988_v60 = vpop.f32.mrb[2].mxu1  ;;  %v1174_v9 = vmax.f32 %v728_v57, 0.0  ;;  %v1176_v10 = vmax.f32 %v985_v58, 0.0 }
  0xf3   : > { %v732_v61 = vadd.f32 %v731_v59, %v410_v54  ;;  %v989_v62 = vadd.f32 %v988_v60, %v410_v54  ;;  %v733_v63 = vpop.f32.mrb[3].mxu0  ;;  %v990_v0 = vpop.f32.mrb[3].mxu1 }
  0xf4   : > { %v734_v2 = vadd.f32 %v733_v63, %v410_v54  ;;  %v991_v3 = vadd.f32 %v990_v0, %v410_v54 }
  0xf5   : > { %v1177_v7 = vmax.f32 %v732_v61, 0.0  ;;  %v1179_v8 = vmax.f32 %v989_v62, 0.0 }
  0xf6   : > { %v1178_v11 = vmax.f32 %v734_v2, 0.0  ;;  %v1180_v12 = vmax.f32 %v991_v3, 0.0  ;;  %v737_v13 = vpop.f32.mrb[4].mxu0  ;;  %v994_v14 = vpop.f32.mrb[4].mxu1 }
  0xf7   : > { %v2833_v15 = vpack.c.bf16 %v1177_v7, %v1173_v4  ;;  %v2897_v16 = vpack.c.bf16 %v1179_v8, %v1175_v6  ;;  %v739_v17 = vpop.f32.mrb[5].mxu0  ;;  %v996_v18 = vpop.f32.mrb[5].mxu1  ;;  %v738_v22 = vadd.f32 %v737_v13, %v415_v53  ;;  %v995_v23 = vadd.f32 %v994_v14, %v415_v53 }
  0xf8   : > { %v2831_v19 = vpack.c.bf16 %v1178_v11, %v1174_v9  ;;  %v2895_v20 = vpack.c.bf16 %v1180_v12, %v1176_v10  ;;  %v740_v24 = vadd.f32 %v739_v17, %v415_v53  ;;  %v997_v25 = vadd.f32 %v996_v18, %v415_v53  ;;  %v440_v18 = vpop.permute.xlu1 %439 }
  0xf9   : > { %v1181_v34 = vmax.f32 %v738_v22, 0.0  ;;  %v1183_v35 = vmax.f32 %v995_v23, 0.0 }
  0xfa   : > { %v743_v26 = vpop.f32.mrb[6].mxu0  ;;  %v1000_v27 = vpop.f32.mrb[6].mxu1  ;;  %2832 = vmatprep.subr.bf16.mxu0 %v2831_v19  ;;  %2896 = vmatprep.subr.bf16.mxu1 %v2895_v20  ;;  %v1182_v38 = vmax.f32 %v740_v24, 0.0  ;;  %v1184_v39 = vmax.f32 %v997_v25, 0.0 }
  0xfb   : > { %v744_v28 = vadd.f32 %v743_v26, %v420_v21  ;;  %v1001_v29 = vadd.f32 %v1000_v27, %v420_v21  ;;  %v745_v30 = vpop.f32.mrb[7].mxu0  ;;  %v1002_v31 = vpop.f32.mrb[7].mxu1  ;;  %2834 = vmatpush1.bf16.msra.mxu0 %v2833_v15  ;;  %2898 = vmatpush1.bf16.msra.mxu1 %v2897_v16 }
  0xfc   : > { %v746_v32 = vadd.f32 %v745_v30, %v420_v21  ;;  %v1003_v33 = vadd.f32 %v1002_v31, %v420_v21  ;;  %v435_v15 = vpop.permute.xlu0 %434 }
  0xfd   : > { %v1185_v36 = vmax.f32 %v744_v28, 0.0  ;;  %v1187_v37 = vmax.f32 %v1001_v29, 0.0 }
  0xfe   : > { %v1186_v40 = vmax.f32 %v746_v32, 0.0  ;;  %v1188_v41 = vmax.f32 %v1003_v33, 0.0  ;;  %v749_v42 = vpop.f32.mrb[8].mxu0  ;;  %v1006_v43 = vpop.f32.mrb[8].mxu1 }
  0xff   : > { %v2837_v44 = vpack.c.bf16 %v1185_v36, %v1181_v34  ;;  %v2901_v45 = vpack.c.bf16 %v1187_v37, %v1183_v35  ;;  %v751_v46 = vpop.f32.mrb[9].mxu0  ;;  %v1008_v47 = vpop.f32.mrb[9].mxu1  ;;  %v750_v52 = vadd.f32 %v749_v42, %v425_v48  ;;  %v1007_v53 = vadd.f32 %v1006_v43, %v425_v48 }
 0x100   : > { %v2835_v49 = vpack.c.bf16 %v1186_v40, %v1182_v38  ;;  %v2899_v50 = vpack.c.bf16 %v1188_v41, %v1184_v39  ;;  %v752_v54 = vadd.f32 %v751_v46, %v425_v48  ;;  %v1009_v55 = vadd.f32 %v1008_v47, %v425_v48  ;;  %v450_v48 = vpop.permute.xlu1 %449 }
 0x101   : > { %v1189_v0 = vmax.f32 %v750_v52, 0.0  ;;  %v1191_v1 = vmax.f32 %v1007_v53, 0.0 }
 0x102   : > { %v755_v56 = vpop.f32.mrb[10].mxu0  ;;  %v1012_v57 = vpop.f32.mrb[10].mxu1  ;;  %2836 = vmatprep.subr.bf16.mxu0 %v2835_v49  ;;  %2900 = vmatprep.subr.bf16.mxu1 %v2899_v50  ;;  %v1190_v4 = vmax.f32 %v752_v54, 0.0  ;;  %v1192_v6 = vmax.f32 %v1009_v55, 0.0 }
 0x103   : > { %v756_v58 = vadd.f32 %v755_v56, %v430_v51  ;;  %v1013_v59 = vadd.f32 %v1012_v57, %v430_v51  ;;  %v757_v60 = vpop.f32.mrb[11].mxu0  ;;  %v1014_v61 = vpop.f32.mrb[11].mxu1  ;;  %2838 = vmatpush1.bf16.msra.mxu0 %v2837_v44  ;;  %2902 = vmatpush1.bf16.msra.mxu1 %v2901_v45 }
 0x104   : > { %v758_v62 = vadd.f32 %v757_v60, %v430_v51  ;;  %v1015_v63 = vadd.f32 %v1014_v61, %v430_v51  ;;  %v445_v45 = vpop.permute.xlu0 %444 }
 0x105   : > { %v1193_v2 = vmax.f32 %v756_v58, 0.0  ;;  %v1195_v3 = vmax.f32 %v1013_v59, 0.0 }
 0x106   : > { %v1194_v7 = vmax.f32 %v758_v62, 0.0  ;;  %v1196_v8 = vmax.f32 %v1015_v63, 0.0  ;;  %v761_v9 = vpop.f32.mrb[12].mxu0  ;;  %v1018_v10 = vpop.f32.mrb[12].mxu1 }
 0x107   : > { %v2841_v11 = vpack.c.bf16 %v1193_v2, %v1189_v0  ;;  %v2905_v12 = vpack.c.bf16 %v1195_v3, %v1191_v1  ;;  %v763_v13 = vpop.f32.mrb[13].mxu0  ;;  %v1020_v14 = vpop.f32.mrb[13].mxu1  ;;  %v762_v19 = vadd.f32 %v761_v9, %v435_v15  ;;  %v1019_v20 = vadd.f32 %v1018_v10, %v435_v15 }
 0x108   : > { %v2839_v16 = vpack.c.bf16 %v1194_v7, %v1190_v4  ;;  %v2903_v17 = vpack.c.bf16 %v1196_v8, %v1192_v6  ;;  %v764_v21 = vadd.f32 %v763_v13, %v435_v15  ;;  %v1021_v22 = vadd.f32 %v1020_v14, %v435_v15  ;;  %v460_v15 = vpop.permute.xlu1 %459 }
 0x109   : > { %v1197_v31 = vmax.f32 %v762_v19, 0.0  ;;  %v1199_v32 = vmax.f32 %v1019_v20, 0.0 }
 0x10a   : > { %v767_v23 = vpop.f32.mrb[14].mxu0  ;;  %v1024_v24 = vpop.f32.mrb[14].mxu1  ;;  %2840 = vmatprep.subr.bf16.mxu0 %v2839_v16  ;;  %2904 = vmatprep.subr.bf16.mxu1 %v2903_v17  ;;  %v1198_v35 = vmax.f32 %v764_v21, 0.0  ;;  %v1200_v36 = vmax.f32 %v1021_v22, 0.0 }
 0x10b   : > { %v768_v25 = vadd.f32 %v767_v23, %v440_v18  ;;  %v1025_v26 = vadd.f32 %v1024_v24, %v440_v18  ;;  %v769_v27 = vpop.f32.mrb[15].mxu0  ;;  %v1026_v28 = vpop.f32.mrb[15].mxu1  ;;  %2842 = vmatpush1.bf16.msra.mxu0 %v2841_v11  ;;  %2906 = vmatpush1.bf16.msra.mxu1 %v2905_v12 }
 0x10c   : > { %v770_v29 = vadd.f32 %v769_v27, %v440_v18  ;;  %v1027_v30 = vadd.f32 %v1026_v28, %v440_v18  ;;  %v455_v12 = vpop.permute.xlu0 %454 }
 0x10d   : > { %v1201_v33 = vmax.f32 %v768_v25, 0.0  ;;  %v1203_v34 = vmax.f32 %v1025_v26, 0.0 }
 0x10e   : > { %v1202_v37 = vmax.f32 %v770_v29, 0.0  ;;  %v1204_v38 = vmax.f32 %v1027_v30, 0.0  ;;  %v773_v39 = vpop.f32.mrb[16].mxu0  ;;  %v1030_v40 = vpop.f32.mrb[16].mxu1 }
 0x10f   : > { %v2845_v41 = vpack.c.bf16 %v1201_v33, %v1197_v31  ;;  %v2909_v42 = vpack.c.bf16 %v1203_v34, %v1199_v32  ;;  %v775_v43 = vpop.f32.mrb[17].mxu0  ;;  %v1032_v44 = vpop.f32.mrb[17].mxu1  ;;  %v774_v49 = vadd.f32 %v773_v39, %v445_v45  ;;  %v1031_v50 = vadd.f32 %v1030_v40, %v445_v45 }
 0x110   : > { %v2843_v46 = vpack.c.bf16 %v1202_v37, %v1198_v35  ;;  %v2907_v47 = vpack.c.bf16 %v1204_v38, %v1200_v36  ;;  %v776_v51 = vadd.f32 %v775_v43, %v445_v45  ;;  %v1033_v52 = vadd.f32 %v1032_v44, %v445_v45  ;;  %v470_v45 = vpop.permute.xlu1 %469 }
 0x111   : > { %v1205_v61 = vmax.f32 %v774_v49, 0.0  ;;  %v1207_v62 = vmax.f32 %v1031_v50, 0.0 }
 0x112   : > { %v779_v53 = vpop.f32.mrb[18].mxu0  ;;  %v1036_v54 = vpop.f32.mrb[18].mxu1  ;;  %2844 = vmatprep.subr.bf16.mxu0 %v2843_v46  ;;  %2908 = vmatprep.subr.bf16.mxu1 %v2907_v47  ;;  %v1206_v1 = vmax.f32 %v776_v51, 0.0  ;;  %v1208_v2 = vmax.f32 %v1033_v52, 0.0 }
 0x113   : > { %v780_v55 = vadd.f32 %v779_v53, %v450_v48  ;;  %v1037_v56 = vadd.f32 %v1036_v54, %v450_v48  ;;  %v781_v57 = vpop.f32.mrb[19].mxu0  ;;  %v1038_v58 = vpop.f32.mrb[19].mxu1  ;;  %2846 = vmatpush1.bf16.msra.mxu0 %v2845_v41  ;;  %2910 = vmatpush1.bf16.msra.mxu1 %v2909_v42 }
 0x114   : > { %v782_v59 = vadd.f32 %v781_v57, %v450_v48  ;;  %v1039_v60 = vadd.f32 %v1038_v58, %v450_v48  ;;  %v465_v42 = vpop.permute.xlu0 %464 }
 0x115   : > { %v1209_v63 = vmax.f32 %v780_v55, 0.0  ;;  %v1211_v0 = vmax.f32 %v1037_v56, 0.0 }
 0x116   : > { %v1210_v3 = vmax.f32 %v782_v59, 0.0  ;;  %v1212_v4 = vmax.f32 %v1039_v60, 0.0  ;;  %v785_v6 = vpop.f32.mrb[20].mxu0  ;;  %v1042_v7 = vpop.f32.mrb[20].mxu1 }
 0x117   : > { %v2849_v8 = vpack.c.bf16 %v1209_v63, %v1205_v61  ;;  %v2913_v9 = vpack.c.bf16 %v1211_v0, %v1207_v62  ;;  %v787_v10 = vpop.f32.mrb[21].mxu0  ;;  %v1044_v11 = vpop.f32.mrb[21].mxu1  ;;  %v786_v16 = vadd.f32 %v785_v6, %v455_v12  ;;  %v1043_v17 = vadd.f32 %v1042_v7, %v455_v12 }
 0x118   : > { %v2847_v13 = vpack.c.bf16 %v1210_v3, %v1206_v1  ;;  %v2911_v14 = vpack.c.bf16 %v1212_v4, %v1208_v2  ;;  %v788_v18 = vadd.f32 %v787_v10, %v455_v12  ;;  %v1045_v19 = vadd.f32 %v1044_v11, %v455_v12  ;;  %v480_v12 = vpop.permute.xlu1 %479 }
 0x119   : > { %v1213_v28 = vmax.f32 %v786_v16, 0.0  ;;  %v1215_v29 = vmax.f32 %v1043_v17, 0.0 }
 0x11a   : > { %v791_v20 = vpop.f32.mrb[22].mxu0  ;;  %v1048_v21 = vpop.f32.mrb[22].mxu1  ;;  %2848 = vmatprep.subr.bf16.mxu0 %v2847_v13  ;;  %2912 = vmatprep.subr.bf16.mxu1 %v2911_v14  ;;  %v1214_v32 = vmax.f32 %v788_v18, 0.0  ;;  %v1216_v33 = vmax.f32 %v1045_v19, 0.0 }
 0x11b   : > { %v792_v22 = vadd.f32 %v791_v20, %v460_v15  ;;  %v1049_v23 = vadd.f32 %v1048_v21, %v460_v15  ;;  %v793_v24 = vpop.f32.mrb[23].mxu0  ;;  %v1050_v25 = vpop.f32.mrb[23].mxu1  ;;  %2850 = vmatpush1.bf16.msra.mxu0 %v2849_v8  ;;  %2914 = vmatpush1.bf16.msra.mxu1 %v2913_v9 }
 0x11c   : > { %v794_v26 = vadd.f32 %v793_v24, %v460_v15  ;;  %v1051_v27 = vadd.f32 %v1050_v25, %v460_v15  ;;  %v475_v9 = vpop.permute.xlu0 %474 }
 0x11d   : > { %v1217_v30 = vmax.f32 %v792_v22, 0.0  ;;  %v1219_v31 = vmax.f32 %v1049_v23, 0.0 }
 0x11e   : > { %v1218_v34 = vmax.f32 %v794_v26, 0.0  ;;  %v1220_v35 = vmax.f32 %v1051_v27, 0.0  ;;  %v797_v36 = vpop.f32.mrb[24].mxu0  ;;  %v1054_v37 = vpop.f32.mrb[24].mxu1 }
 0x11f   : > { %v2853_v38 = vpack.c.bf16 %v1217_v30, %v1213_v28  ;;  %v2917_v39 = vpack.c.bf16 %v1219_v31, %v1215_v29  ;;  %v799_v40 = vpop.f32.mrb[25].mxu0  ;;  %v1056_v41 = vpop.f32.mrb[25].mxu1  ;;  %v798_v46 = vadd.f32 %v797_v36, %v465_v42  ;;  %v1055_v47 = vadd.f32 %v1054_v37, %v465_v42 }
 0x120   : > { %v2851_v43 = vpack.c.bf16 %v1218_v34, %v1214_v32  ;;  %v2915_v44 = vpack.c.bf16 %v1220_v35, %v1216_v33  ;;  %v800_v48 = vadd.f32 %v799_v40, %v465_v42  ;;  %v1057_v49 = vadd.f32 %v1056_v41, %v465_v42  ;;  %v490_v42 = vpop.permute.xlu1 %489 }
 0x121   : > { %v1221_v58 = vmax.f32 %v798_v46, 0.0  ;;  %v1223_v59 = vmax.f32 %v1055_v47, 0.0 }
 0x122   : > { %v803_v50 = vpop.f32.mrb[26].mxu0  ;;  %v1060_v51 = vpop.f32.mrb[26].mxu1  ;;  %2852 = vmatprep.subr.bf16.mxu0 %v2851_v43  ;;  %2916 = vmatprep.subr.bf16.mxu1 %v2915_v44  ;;  %v1222_v62 = vmax.f32 %v800_v48, 0.0  ;;  %v1224_v63 = vmax.f32 %v1057_v49, 0.0 }
 0x123   : > { %v804_v52 = vadd.f32 %v803_v50, %v470_v45  ;;  %v1061_v53 = vadd.f32 %v1060_v51, %v470_v45  ;;  %v805_v54 = vpop.f32.mrb[27].mxu0  ;;  %v1062_v55 = vpop.f32.mrb[27].mxu1  ;;  %2854 = vmatpush1.bf16.msra.mxu0 %v2853_v38  ;;  %2918 = vmatpush1.bf16.msra.mxu1 %v2917_v39 }
 0x124   : > { %v806_v56 = vadd.f32 %v805_v54, %v470_v45  ;;  %v1063_v57 = vadd.f32 %v1062_v55, %v470_v45  ;;  %v485_v39 = vpop.permute.xlu0 %484 }
 0x125   : > { %v1225_v60 = vmax.f32 %v804_v52, 0.0  ;;  %v1227_v61 = vmax.f32 %v1061_v53, 0.0 }
 0x126   : > { %v1226_v0 = vmax.f32 %v806_v56, 0.0  ;;  %v1228_v1 = vmax.f32 %v1063_v57, 0.0  ;;  %v809_v2 = vpop.f32.mrb[28].mxu0  ;;  %v1066_v3 = vpop.f32.mrb[28].mxu1 }
 0x127   : > { %v2857_v4 = vpack.c.bf16 %v1225_v60, %v1221_v58  ;;  %v2921_v6 = vpack.c.bf16 %v1227_v61, %v1223_v59  ;;  %v811_v7 = vpop.f32.mrb[29].mxu0  ;;  %v1068_v8 = vpop.f32.mrb[29].mxu1  ;;  %v810_v13 = vadd.f32 %v809_v2, %v475_v9  ;;  %v1067_v14 = vadd.f32 %v1066_v3, %v475_v9 }
 0x128   : > { %v2855_v10 = vpack.c.bf16 %v1226_v0, %v1222_v62  ;;  %v2919_v11 = vpack.c.bf16 %v1228_v1, %v1224_v63  ;;  %v812_v15 = vadd.f32 %v811_v7, %v475_v9  ;;  %v1069_v16 = vadd.f32 %v1068_v8, %v475_v9  ;;  %v500_v9 = vpop.permute.xlu1 %499 }
 0x129   : > { %v1229_v25 = vmax.f32 %v810_v13, 0.0  ;;  %v1231_v26 = vmax.f32 %v1067_v14, 0.0 }
 0x12a   : > { %v815_v17 = vpop.f32.mrb[30].mxu0  ;;  %v1072_v18 = vpop.f32.mrb[30].mxu1  ;;  %2856 = vmatprep.subr.bf16.mxu0 %v2855_v10  ;;  %2920 = vmatprep.subr.bf16.mxu1 %v2919_v11  ;;  %v1230_v29 = vmax.f32 %v812_v15, 0.0  ;;  %v1232_v30 = vmax.f32 %v1069_v16, 0.0 }
 0x12b   : > { %v816_v19 = vadd.f32 %v815_v17, %v480_v12  ;;  %v1073_v20 = vadd.f32 %v1072_v18, %v480_v12  ;;  %v817_v21 = vpop.f32.mrb[31].mxu0  ;;  %v1074_v22 = vpop.f32.mrb[31].mxu1  ;;  %2858 = vmatpush1.bf16.msra.mxu0 %v2857_v4  ;;  %2922 = vmatpush1.bf16.msra.mxu1 %v2921_v6 }
 0x12c   : > { %v818_v23 = vadd.f32 %v817_v21, %v480_v12  ;;  %v1075_v24 = vadd.f32 %v1074_v22, %v480_v12  ;;  %v495_v6 = vpop.permute.xlu0 %494 }
 0x12d   : > { %v1233_v27 = vmax.f32 %v816_v19, 0.0  ;;  %v1235_v28 = vmax.f32 %v1073_v20, 0.0 }
 0x12e   : > { %v1234_v31 = vmax.f32 %v818_v23, 0.0  ;;  %v1236_v32 = vmax.f32 %v1075_v24, 0.0  ;;  %v821_v33 = vpop.f32.mrb[32].mxu0  ;;  %v1078_v34 = vpop.f32.mrb[32].mxu1 }
 0x12f   : > { %v2861_v35 = vpack.c.bf16 %v1233_v27, %v1229_v25  ;;  %v2925_v36 = vpack.c.bf16 %v1235_v28, %v1231_v26  ;;  %v823_v37 = vpop.f32.mrb[33].mxu0  ;;  %v1080_v38 = vpop.f32.mrb[33].mxu1  ;;  %v822_v43 = vadd.f32 %v821_v33, %v485_v39  ;;  %v1079_v44 = vadd.f32 %v1078_v34, %v485_v39 }
 0x130   : > { %v2859_v40 = vpack.c.bf16 %v1234_v31, %v1230_v29  ;;  %v2923_v41 = vpack.c.bf16 %v1236_v32, %v1232_v30  ;;  %v824_v45 = vadd.f32 %v823_v37, %v485_v39  ;;  %v1081_v46 = vadd.f32 %v1080_v38, %v485_v39  ;;  %v510_v39 = vpop.permute.xlu1 %509 }
 0x131   : > { %v1237_v55 = vmax.f32 %v822_v43, 0.0  ;;  %v1239_v56 = vmax.f32 %v1079_v44, 0.0 }
 0x132   : > { %v827_v47 = vpop.f32.mrb[34].mxu0  ;;  %v1084_v48 = vpop.f32.mrb[34].mxu1  ;;  %2860 = vmatprep.subr.bf16.mxu0 %v2859_v40  ;;  %2924 = vmatprep.subr.bf16.mxu1 %v2923_v41  ;;  %v1238_v59 = vmax.f32 %v824_v45, 0.0  ;;  %v1240_v60 = vmax.f32 %v1081_v46, 0.0 }
 0x133   : > { %v828_v49 = vadd.f32 %v827_v47, %v490_v42  ;;  %v1085_v50 = vadd.f32 %v1084_v48, %v490_v42  ;;  %v829_v51 = vpop.f32.mrb[35].mxu0  ;;  %v1086_v52 = vpop.f32.mrb[35].mxu1  ;;  %2862 = vmatpush1.bf16.msra.mxu0 %v2861_v35  ;;  %2926 = vmatpush1.bf16.msra.mxu1 %v2925_v36 }
 0x134   : > { %v830_v53 = vadd.f32 %v829_v51, %v490_v42  ;;  %v1087_v54 = vadd.f32 %v1086_v52, %v490_v42  ;;  %v505_v36 = vpop.permute.xlu0 %504 }
 0x135   : > { %v1241_v57 = vmax.f32 %v828_v49, 0.0  ;;  %v1243_v58 = vmax.f32 %v1085_v50, 0.0 }
 0x136   : > { %v1242_v61 = vmax.f32 %v830_v53, 0.0  ;;  %v1244_v62 = vmax.f32 %v1087_v54, 0.0  ;;  %v833_v63 = vpop.f32.mrb[36].mxu0  ;;  %v1090_v0 = vpop.f32.mrb[36].mxu1 }
 0x137   : > { %v2865_v1 = vpack.c.bf16 %v1241_v57, %v1237_v55  ;;  %v2929_v2 = vpack.c.bf16 %v1243_v58, %v1239_v56  ;;  %v835_v3 = vpop.f32.mrb[37].mxu0  ;;  %v1092_v4 = vpop.f32.mrb[37].mxu1  ;;  %v834_v10 = vadd.f32 %v833_v63, %v495_v6  ;;  %v1091_v11 = vadd.f32 %v1090_v0, %v495_v6 }
 0x138   : > { %v2863_v7 = vpack.c.bf16 %v1242_v61, %v1238_v59  ;;  %v2927_v8 = vpack.c.bf16 %v1244_v62, %v1240_v60  ;;  %v836_v12 = vadd.f32 %v835_v3, %v495_v6  ;;  %v1093_v13 = vadd.f32 %v1092_v4, %v495_v6  ;;  %v520_v6 = vpop.permute.xlu1 %519 }
 0x139   : > { %v1245_v22 = vmax.f32 %v834_v10, 0.0  ;;  %v1247_v23 = vmax.f32 %v1091_v11, 0.0 }
 0x13a   : > { %v839_v14 = vpop.f32.mrb[38].mxu0  ;;  %v1096_v15 = vpop.f32.mrb[38].mxu1  ;;  %2864 = vmatprep.subr.bf16.mxu0 %v2863_v7  ;;  %2928 = vmatprep.subr.bf16.mxu1 %v2927_v8  ;;  %v1246_v26 = vmax.f32 %v836_v12, 0.0  ;;  %v1248_v27 = vmax.f32 %v1093_v13, 0.0 }
 0x13b   : > { %v840_v16 = vadd.f32 %v839_v14, %v500_v9  ;;  %v1097_v17 = vadd.f32 %v1096_v15, %v500_v9  ;;  %v841_v18 = vpop.f32.mrb[39].mxu0  ;;  %v1098_v19 = vpop.f32.mrb[39].mxu1  ;;  %2866 = vmatpush1.bf16.msra.mxu0 %v2865_v1  ;;  %2930 = vmatpush1.bf16.msra.mxu1 %v2929_v2 }
 0x13c   : > { %v842_v20 = vadd.f32 %v841_v18, %v500_v9  ;;  %v1099_v21 = vadd.f32 %v1098_v19, %v500_v9  ;;  %v515_v2 = vpop.permute.xlu0 %514 }
 0x13d   : > { %v1249_v24 = vmax.f32 %v840_v16, 0.0  ;;  %v1251_v25 = vmax.f32 %v1097_v17, 0.0 }
 0x13e   : > { %v1250_v28 = vmax.f32 %v842_v20, 0.0  ;;  %v1252_v29 = vmax.f32 %v1099_v21, 0.0  ;;  %v845_v30 = vpop.f32.mrb[40].mxu0  ;;  %v1102_v31 = vpop.f32.mrb[40].mxu1 }
 0x13f   : > { %v2869_v32 = vpack.c.bf16 %v1249_v24, %v1245_v22  ;;  %v2933_v33 = vpack.c.bf16 %v1251_v25, %v1247_v23  ;;  %v847_v34 = vpop.f32.mrb[41].mxu0  ;;  %v1104_v35 = vpop.f32.mrb[41].mxu1  ;;  %v846_v40 = vadd.f32 %v845_v30, %v505_v36  ;;  %v1103_v41 = vadd.f32 %v1102_v31, %v505_v36 }
 0x140   : > { %v2867_v37 = vpack.c.bf16 %v1250_v28, %v1246_v26  ;;  %v2931_v38 = vpack.c.bf16 %v1252_v29, %v1248_v27  ;;  %v848_v42 = vadd.f32 %v847_v34, %v505_v36  ;;  %v1105_v43 = vadd.f32 %v1104_v35, %v505_v36  ;;  %v530_v36 = vpop.permute.xlu1 %529 }
 0x141   : > { %v1253_v52 = vmax.f32 %v846_v40, 0.0  ;;  %v1255_v53 = vmax.f32 %v1103_v41, 0.0 }
 0x142   : > { %v851_v44 = vpop.f32.mrb[42].mxu0  ;;  %v1108_v45 = vpop.f32.mrb[42].mxu1  ;;  %2868 = vmatprep.subr.bf16.mxu0 %v2867_v37  ;;  %2932 = vmatprep.subr.bf16.mxu1 %v2931_v38  ;;  %v1254_v56 = vmax.f32 %v848_v42, 0.0  ;;  %v1256_v57 = vmax.f32 %v1105_v43, 0.0 }
 0x143   : > { %v852_v46 = vadd.f32 %v851_v44, %v510_v39  ;;  %v1109_v47 = vadd.f32 %v1108_v45, %v510_v39  ;;  %v853_v48 = vpop.f32.mrb[43].mxu0  ;;  %v1110_v49 = vpop.f32.mrb[43].mxu1  ;;  %2870 = vmatpush1.bf16.msra.mxu0 %v2869_v32  ;;  %2934 = vmatpush1.bf16.msra.mxu1 %v2933_v33 }
 0x144   : > { %v854_v50 = vadd.f32 %v853_v48, %v510_v39  ;;  %v1111_v51 = vadd.f32 %v1110_v49, %v510_v39  ;;  %v525_v33 = vpop.permute.xlu0 %524 }
 0x145   : > { %v1257_v54 = vmax.f32 %v852_v46, 0.0  ;;  %v1259_v55 = vmax.f32 %v1109_v47, 0.0 }
 0x146   : > { %v1258_v58 = vmax.f32 %v854_v50, 0.0  ;;  %v1260_v59 = vmax.f32 %v1111_v51, 0.0  ;;  %v857_v60 = vpop.f32.mrb[44].mxu0  ;;  %v1114_v61 = vpop.f32.mrb[44].mxu1 }
 0x147   : > { %v2873_v62 = vpack.c.bf16 %v1257_v54, %v1253_v52  ;;  %v2937_v63 = vpack.c.bf16 %v1259_v55, %v1255_v53  ;;  %v859_v0 = vpop.f32.mrb[45].mxu0  ;;  %v1116_v1 = vpop.f32.mrb[45].mxu1  ;;  %v858_v7 = vadd.f32 %v857_v60, %v515_v2  ;;  %v1115_v8 = vadd.f32 %v1114_v61, %v515_v2 }
 0x148   : > { %v2871_v3 = vpack.c.bf16 %v1258_v58, %v1254_v56  ;;  %v2935_v4 = vpack.c.bf16 %v1260_v59, %v1256_v57  ;;  %v860_v9 = vadd.f32 %v859_v0, %v515_v2  ;;  %v1117_v10 = vadd.f32 %v1116_v1, %v515_v2  ;;  %v540_v2 = vpop.permute.xlu1 %539 }
 0x149   : > { %v1261_v19 = vmax.f32 %v858_v7, 0.0  ;;  %v1263_v20 = vmax.f32 %v1115_v8, 0.0 }
 0x14a   : > { %v863_v11 = vpop.f32.mrb[46].mxu0  ;;  %v1120_v12 = vpop.f32.mrb[46].mxu1  ;;  %2872 = vmatprep.subr.bf16.mxu0 %v2871_v3  ;;  %2936 = vmatprep.subr.bf16.mxu1 %v2935_v4  ;;  %v1262_v23 = vmax.f32 %v860_v9, 0.0  ;;  %v1264_v24 = vmax.f32 %v1117_v10, 0.0 }
 0x14b   : > { %v864_v13 = vadd.f32 %v863_v11, %v520_v6  ;;  %v1121_v14 = vadd.f32 %v1120_v12, %v520_v6  ;;  %v865_v15 = vpop.f32.mrb[47].mxu0  ;;  %v1122_v16 = vpop.f32.mrb[47].mxu1  ;;  %2874 = vmatpush1.bf16.msra.mxu0 %v2873_v62  ;;  %2938 = vmatpush1.bf16.msra.mxu1 %v2937_v63 }
 0x14c   : > { %v866_v17 = vadd.f32 %v865_v15, %v520_v6  ;;  %v1123_v18 = vadd.f32 %v1122_v16, %v520_v6  ;;  %v535_v63 = vpop.permute.xlu0 %534 }
 0x14d   : > { %v1265_v21 = vmax.f32 %v864_v13, 0.0  ;;  %v1267_v22 = vmax.f32 %v1121_v14, 0.0 }
 0x14e   : > { %v1266_v25 = vmax.f32 %v866_v17, 0.0  ;;  %v1268_v26 = vmax.f32 %v1123_v18, 0.0  ;;  %v869_v27 = vpop.f32.mrb[48].mxu0  ;;  %v1126_v28 = vpop.f32.mrb[48].mxu1 }
 0x14f   : > { %v2877_v29 = vpack.c.bf16 %v1265_v21, %v1261_v19  ;;  %v2941_v30 = vpack.c.bf16 %v1267_v22, %v1263_v20  ;;  %v871_v31 = vpop.f32.mrb[49].mxu0  ;;  %v1128_v32 = vpop.f32.mrb[49].mxu1  ;;  %v870_v37 = vadd.f32 %v869_v27, %v525_v33  ;;  %v1127_v38 = vadd.f32 %v1126_v28, %v525_v33 }
 0x150   : > { %v2875_v34 = vpack.c.bf16 %v1266_v25, %v1262_v23  ;;  %v2939_v35 = vpack.c.bf16 %v1268_v26, %v1264_v24  ;;  %v872_v39 = vadd.f32 %v871_v31, %v525_v33  ;;  %v1129_v40 = vadd.f32 %v1128_v32, %v525_v33  ;;  %v550_v33 = vpop.permute.xlu1 %549 }
 0x151   : > { %v1269_v49 = vmax.f32 %v870_v37, 0.0  ;;  %v1271_v50 = vmax.f32 %v1127_v38, 0.0 }
 0x152   : > { %v875_v41 = vpop.f32.mrb[50].mxu0  ;;  %v1132_v42 = vpop.f32.mrb[50].mxu1  ;;  %2876 = vmatprep.subr.bf16.mxu0 %v2875_v34  ;;  %2940 = vmatprep.subr.bf16.mxu1 %v2939_v35  ;;  %v1270_v53 = vmax.f32 %v872_v39, 0.0  ;;  %v1272_v54 = vmax.f32 %v1129_v40, 0.0 }
 0x153   : > { %v876_v43 = vadd.f32 %v875_v41, %v530_v36  ;;  %v1133_v44 = vadd.f32 %v1132_v42, %v530_v36  ;;  %v877_v45 = vpop.f32.mrb[51].mxu0  ;;  %v1134_v46 = vpop.f32.mrb[51].mxu1  ;;  %2878 = vmatpush1.bf16.msra.mxu0 %v2877_v29  ;;  %2942 = vmatpush1.bf16.msra.mxu1 %v2941_v30 }
 0x154   : > { %v878_v47 = vadd.f32 %v877_v45, %v530_v36  ;;  %v1135_v48 = vadd.f32 %v1134_v46, %v530_v36  ;;  %v545_v30 = vpop.permute.xlu0 %544 }
 0x155   : > { %v1273_v51 = vmax.f32 %v876_v43, 0.0  ;;  %v1275_v52 = vmax.f32 %v1133_v44, 0.0 }
 0x156   : > { %v1274_v55 = vmax.f32 %v878_v47, 0.0  ;;  %v1276_v56 = vmax.f32 %v1135_v48, 0.0  ;;  %v881_v57 = vpop.f32.mrb[52].mxu0  ;;  %v1138_v58 = vpop.f32.mrb[52].mxu1 }
 0x157   : > { %v2881_v59 = vpack.c.bf16 %v1273_v51, %v1269_v49  ;;  %v2945_v60 = vpack.c.bf16 %v1275_v52, %v1271_v50  ;;  %v883_v61 = vpop.f32.mrb[53].mxu0  ;;  %v1140_v62 = vpop.f32.mrb[53].mxu1  ;;  %v882_v3 = vadd.f32 %v881_v57, %v535_v63  ;;  %v1139_v4 = vadd.f32 %v1138_v58, %v535_v63 }
 0x158   : > { %v2879_v0 = vpack.c.bf16 %v1274_v55, %v1270_v53  ;;  %v2943_v1 = vpack.c.bf16 %v1276_v56, %v1272_v54  ;;  %v884_v6 = vadd.f32 %v883_v61, %v535_v63  ;;  %v1141_v7 = vadd.f32 %v1140_v62, %v535_v63  ;;  %v560_v63 = vpop.permute.xlu1 %559 }
 0x159   : > { %v1277_v16 = vmax.f32 %v882_v3, 0.0  ;;  %v1279_v17 = vmax.f32 %v1139_v4, 0.0 }
 0x15a   : > { %v887_v8 = vpop.f32.mrb[54].mxu0  ;;  %v1144_v9 = vpop.f32.mrb[54].mxu1  ;;  %2880 = vmatprep.subr.bf16.mxu0 %v2879_v0  ;;  %2944 = vmatprep.subr.bf16.mxu1 %v2943_v1  ;;  %v1278_v20 = vmax.f32 %v884_v6, 0.0  ;;  %v1280_v21 = vmax.f32 %v1141_v7, 0.0 }
 0x15b   : > { %v888_v10 = vadd.f32 %v887_v8, %v540_v2  ;;  %v1145_v11 = vadd.f32 %v1144_v9, %v540_v2  ;;  %v889_v12 = vpop.f32.mrb[55].mxu0  ;;  %v1146_v13 = vpop.f32.mrb[55].mxu1  ;;  %2882 = vmatpush1.bf16.msra.mxu0 %v2881_v59  ;;  %2946 = vmatpush1.bf16.msra.mxu1 %v2945_v60 }
 0x15c   : > { %v890_v14 = vadd.f32 %v889_v12, %v540_v2  ;;  %v1147_v15 = vadd.f32 %v1146_v13, %v540_v2  ;;  %v555_v60 = vpop.permute.xlu0 %554 }
 0x15d   : > { %v1281_v18 = vmax.f32 %v888_v10, 0.0  ;;  %v1283_v19 = vmax.f32 %v1145_v11, 0.0 }
 0x15e   : > { %v1282_v22 = vmax.f32 %v890_v14, 0.0  ;;  %v1284_v23 = vmax.f32 %v1147_v15, 0.0  ;;  %v893_v24 = vpop.f32.mrb[56].mxu0  ;;  %v1150_v25 = vpop.f32.mrb[56].mxu1 }
 0x15f   : > { %v2885_v26 = vpack.c.bf16 %v1281_v18, %v1277_v16  ;;  %v2949_v27 = vpack.c.bf16 %v1283_v19, %v1279_v17  ;;  %v895_v28 = vpop.f32.mrb[57].mxu0  ;;  %v1152_v29 = vpop.f32.mrb[57].mxu1  ;;  %v894_v34 = vadd.f32 %v893_v24, %v545_v30  ;;  %v1151_v35 = vadd.f32 %v1150_v25, %v545_v30  ;;  %v1301_v25 = vld [vmem:[%s4069_s3] sm:$0xff] }
 0x160   : > { %v2883_v31 = vpack.c.bf16 %v1282_v22, %v1278_v20  ;;  %v2947_v32 = vpack.c.bf16 %v1284_v23, %v1280_v21  ;;  %v896_v36 = vadd.f32 %v895_v28, %v545_v30  ;;  %v1153_v37 = vadd.f32 %v1152_v29, %v545_v30  ;;  %v1306_v28 = vld [vmem:[%s4069_s3 + $0x28] sm:$0xff]  ;;  %v1305_v29 = vld [vmem:[%s4069_s3 + $0x20] sm:$0xff]  ;;  %v1308_v30 = vld [vmem:[%s4069_s3 + $0x38] sm:$0xff] }
 0x161   : > { %v1285_v46 = vmax.f32 %v894_v34, 0.0  ;;  %v1287_v47 = vmax.f32 %v1151_v35, 0.0  ;;  %v1312_v34 = vld [vmem:[%s4069_s3 + $0x58] sm:$0xff]  ;;  %v1311_v35 = vld [vmem:[%s4069_s3 + $0x50] sm:$0xff] }
 0x162   : > { %v899_v38 = vpop.f32.mrb[58].mxu0  ;;  %v1156_v39 = vpop.f32.mrb[58].mxu1  ;;  %2884 = vmatprep.subr.bf16.mxu0 %v2883_v31  ;;  %2948 = vmatprep.subr.bf16.mxu1 %v2947_v32  ;;  %v1286_v50 = vmax.f32 %v896_v36, 0.0  ;;  %v1288_v51 = vmax.f32 %v1153_v37, 0.0  ;;  %v1307_v31 = vld [vmem:[%s4069_s3 + $0x30] sm:$0xff]  ;;  %v1310_v32 = vld [vmem:[%s4069_s3 + $0x48] sm:$0xff] }
 0x163   : > { %v900_v40 = vadd.f32 %v899_v38, %v550_v33  ;;  %v1157_v41 = vadd.f32 %v1156_v39, %v550_v33  ;;  %v901_v42 = vpop.f32.mrb[59].mxu0  ;;  %v1158_v43 = vpop.f32.mrb[59].mxu1  ;;  %2886 = vmatpush1.bf16.msra.mxu0 %v2885_v26  ;;  %2950 = vmatpush1.bf16.msra.mxu1 %v2949_v27  ;;  %v1304_v26 = vld [vmem:[%s4069_s3 + $0x18] sm:$0xff]  ;;  %v1303_v27 = vld [vmem:[%s4069_s3 + $0x10] sm:$0xff]  ;;  %v1314_v36 = vld [vmem:[%s4069_s3 + $0x68] sm:$0xff] }
 0x164   : > { %v902_v44 = vadd.f32 %v901_v42, %v550_v33  ;;  %v1159_v45 = vadd.f32 %v1158_v43, %v550_v33  ;;  %v1309_v33 = vld [vmem:[%s4069_s3 + $0x40] sm:$0xff]  ;;  %v1316_v38 = vld [vmem:[%s4069_s3 + $0x78] sm:$0xff]  ;;  %v1315_v39 = vld [vmem:[%s4069_s3 + $0x70] sm:$0xff] }
 0x165   : > { %v1289_v48 = vmax.f32 %v900_v40, 0.0  ;;  %v1291_v49 = vmax.f32 %v1157_v41, 0.0  ;;  %v1313_v37 = vld [vmem:[%s4069_s3 + $0x60] sm:$0xff]  ;;  %v1318_v40 = vld [vmem:[%s4069_s3 + $0x88] sm:$0xff]  ;;  %v1320_v42 = vld [vmem:[%s4069_s3 + $0x98] sm:$0xff] }
 0x166   : > { %v1290_v52 = vmax.f32 %v902_v44, 0.0  ;;  %v1292_v53 = vmax.f32 %v1159_v45, 0.0  ;;  %v905_v54 = vpop.f32.mrb[60].mxu0  ;;  %v1162_v55 = vpop.f32.mrb[60].mxu1  ;;  %v1317_v41 = vld [vmem:[%s4069_s3 + $0x80] sm:$0xff]  ;;  %v1319_v43 = vld [vmem:[%s4069_s3 + $0x90] sm:$0xff] }
 0x167   : > { %v2889_v56 = vpack.c.bf16 %v1289_v48, %v1285_v46  ;;  %v2953_v57 = vpack.c.bf16 %v1291_v49, %v1287_v47  ;;  %v907_v58 = vpop.f32.mrb[61].mxu0  ;;  %v1164_v59 = vpop.f32.mrb[61].mxu1  ;;  %v906_v0 = vadd.f32 %v905_v54, %v555_v60  ;;  %v1163_v1 = vadd.f32 %v1162_v55, %v555_v60  ;;  %v1322_v44 = vld [vmem:[%s4069_s3 + $0xa8] sm:$0xff]  ;;  %v1321_v45 = vld [vmem:[%s4069_s3 + $0xa0] sm:$0xff]  ;;  %v1324_v46 = vld [vmem:[%s4069_s3 + $0xb8] sm:$0xff] }
 0x168   : > { %v2887_v61 = vpack.c.bf16 %v1290_v52, %v1286_v50  ;;  %v2951_v62 = vpack.c.bf16 %v1292_v53, %v1288_v51  ;;  %v908_v2 = vadd.f32 %v907_v58, %v555_v60  ;;  %v1165_v3 = vadd.f32 %v1164_v59, %v555_v60  ;;  %v1323_v47 = vld [vmem:[%s4069_s3 + $0xb0] sm:$0xff]  ;;  %v1326_v48 = vld [vmem:[%s4069_s3 + $0xc8] sm:$0xff]  ;;  %v1325_v49 = vld [vmem:[%s4069_s3 + $0xc0] sm:$0xff] }
 0x169   : > { %v1293_v13 = vmax.f32 %v906_v0, 0.0  ;;  %v1295_v14 = vmax.f32 %v1163_v1, 0.0  ;;  %v1328_v50 = vld [vmem:[%s4069_s3 + $0xd8] sm:$0xff]  ;;  %v1327_v51 = vld [vmem:[%s4069_s3 + $0xd0] sm:$0xff]  ;;  %v1330_v52 = vld [vmem:[%s4069_s3 + $0xe8] sm:$0xff] }
 0x16a   : > { %v911_v4 = vpop.f32.mrb[62].mxu0  ;;  %v1168_v6 = vpop.f32.mrb[62].mxu1  ;;  %2888 = vmatprep.subr.bf16.mxu0 %v2887_v61  ;;  %2952 = vmatprep.subr.bf16.mxu1 %v2951_v62  ;;  %v1294_v17 = vmax.f32 %v908_v2, 0.0  ;;  %v1296_v18 = vmax.f32 %v1165_v3, 0.0  ;;  %v1329_v53 = vld [vmem:[%s4069_s3 + $0xe0] sm:$0xff]  ;;  %v1332_v54 = vld [vmem:[%s4069_s3 + $0xf8] sm:$0xff] }
 0x16b   : > { %v912_v7 = vadd.f32 %v911_v4, %v560_v63  ;;  %v1169_v8 = vadd.f32 %v1168_v6, %v560_v63  ;;  %v913_v9 = vpop.f32.mrb[63].mxu0  ;;  %v1170_v10 = vpop.f32.mrb[63].mxu1  ;;  %2890 = vmatpush1.bf16.msra.mxu0 %v2889_v56  ;;  %2954 = vmatpush1.bf16.msra.mxu1 %v2953_v57  ;;  %v1331_v55 = vld [vmem:[%s4069_s3 + $0xf0] sm:$0xff]  ;;  %v1334_v56 = vld [vmem:[%s4069_s3 + $0x108] sm:$0xff]  ;;  %v1333_v57 = vld [vmem:[%s4069_s3 + $0x100] sm:$0xff] }
 0x16c   : > { %v914_v11 = vadd.f32 %v913_v9, %v560_v63  ;;  %v1171_v12 = vadd.f32 %v1170_v10, %v560_v63  ;;  %v1336_v58 = vld [vmem:[%s4069_s3 + $0x118] sm:$0xff]  ;;  %v1335_v59 = vld [vmem:[%s4069_s3 + $0x110] sm:$0xff]  ;;  %v1338_v60 = vld [vmem:[%s4069_s3 + $0x128] sm:$0xff] }
 0x16d   : > { %v1297_v15 = vmax.f32 %v912_v7, 0.0  ;;  %v1299_v16 = vmax.f32 %v1169_v8, 0.0  ;;  %v1337_v61 = vld [vmem:[%s4069_s3 + $0x120] sm:$0xff]  ;;  %v1340_v62 = vld [vmem:[%s4069_s3 + $0x138] sm:$0xff]  ;;  %v1339_v63 = vld [vmem:[%s4069_s3 + $0x130] sm:$0xff] }
 0x16e   : > { %v1298_v19 = vmax.f32 %v914_v11, 0.0  ;;  %v1300_v20 = vmax.f32 %v1171_v12, 0.0  ;;  %v1342_v0 = vld [vmem:[%s4069_s3 + $0x148] sm:$0xff]  ;;  %v1341_v1 = vld [vmem:[%s4069_s3 + $0x140] sm:$0xff]  ;;  %v1344_v2 = vld [vmem:[%s4069_s3 + $0x158] sm:$0xff] }
 0x16f   : > { %v2893_v21 = vpack.c.bf16 %v1297_v15, %v1293_v13  ;;  %v2957_v22 = vpack.c.bf16 %v1299_v16, %v1295_v14  ;;  %v1343_v3 = vld [vmem:[%s4069_s3 + $0x150] sm:$0xff]  ;;  %v1346_v4 = vld [vmem:[%s4069_s3 + $0x168] sm:$0xff]  ;;  %v1345_v6 = vld [vmem:[%s4069_s3 + $0x160] sm:$0xff] }
 0x170   : > { %v2891_v23 = vpack.c.bf16 %v1298_v19, %v1294_v17  ;;  %v2955_v24 = vpack.c.bf16 %v1300_v20, %v1296_v18  ;;  %v1348_v7 = vld [vmem:[%s4069_s3 + $0x178] sm:$0xff]  ;;  %v1347_v8 = vld [vmem:[%s4069_s3 + $0x170] sm:$0xff]  ;;  %v1350_v9 = vld [vmem:[%s4069_s3 + $0x188] sm:$0xff] }
 0x171   : > { %v1349_v10 = vld [vmem:[%s4069_s3 + $0x180] sm:$0xff]  ;;  %v1352_v11 = vld [vmem:[%s4069_s3 + $0x198] sm:$0xff]  ;;  %v1351_v12 = vld [vmem:[%s4069_s3 + $0x190] sm:$0xff] }
 0x172   : > { %2892 = vmatprep.subr.bf16.mxu0 %v2891_v23  ;;  %2956 = vmatprep.subr.bf16.mxu1 %v2955_v24  ;;  %v1354_v13 = vld [vmem:[%s4069_s3 + $0x1a8] sm:$0xff]  ;;  %v1353_v14 = vld [vmem:[%s4069_s3 + $0x1a0] sm:$0xff]  ;;  %v1356_v15 = vld [vmem:[%s4069_s3 + $0x1b8] sm:$0xff] }
 0x173   : > { %2894 = vmatpush1.bf16.msra.mxu0 %v2893_v21  ;;  %2958 = vmatpush1.bf16.msra.mxu1 %v2957_v22  ;;  %v1355_v16 = vld [vmem:[%s4069_s3 + $0x1b0] sm:$0xff]  ;;  %v1358_v17 = vld [vmem:[%s4069_s3 + $0x1c8] sm:$0xff]  ;;  %v1357_v18 = vld [vmem:[%s4069_s3 + $0x1c0] sm:$0xff] }
 0x174   : > { %v1360_v19 = vld [vmem:[%s4069_s3 + $0x1d8] sm:$0xff]  ;;  %v1359_v20 = vld [vmem:[%s4069_s3 + $0x1d0] sm:$0xff]  ;;  %v1362_v21 = vld [vmem:[%s4069_s3 + $0x1e8] sm:$0xff] }
 0x175   : > { %v1361_v22 = vld [vmem:[%s4069_s3 + $0x1e0] sm:$0xff]  ;;  %v1364_v23 = vld [vmem:[%s4069_s3 + $0x1f8] sm:$0xff]  ;;  %v1363_v24 = vld [vmem:[%s4069_s3 + $0x1f0] sm:$0xff] }
 0x176   : > { %1622 = vmatmul.mubr.f32.vlgmr.msra.gmra.mrb[64].mxu0 %v1301_v25  ;;  %1879 = vmatmul.mubr.f32.vlgmr.msra.gmra.mrb[64].mxu1 %v1301_v25 }
 0x177   : > { %1627 = vmatprep.mubr.f32.mxu0 %v1304_v26  ;;  %1884 = vmatprep.mubr.f32.mxu1 %v1304_v26 }
 0x17a   : > { %1628 = vmatmul.mubr.f32.gmra.mrb[66].mxu0 %v1303_v27  ;;  %1885 = vmatmul.mubr.f32.gmra.mrb[66].mxu1 %v1303_v27 }
 0x17b   : > { %1633 = vmatprep.mubr.f32.mxu0 %v1306_v28  ;;  %1890 = vmatprep.mubr.f32.mxu1 %v1306_v28 }
 0x17e   : > { %1634 = vmatmul.mubr.f32.gmra.mrb[68].mxu0 %v1305_v29  ;;  %1891 = vmatmul.mubr.f32.gmra.mrb[68].mxu1 %v1305_v29  ;;  %v1400_v29 = vpop.permute.xlu0 %1399 }
 0x17f   : > { %1639 = vmatprep.mubr.f32.mxu0 %v1308_v30  ;;  %1896 = vmatprep.mubr.f32.mxu1 %v1308_v30  ;;  %v1405_v30 = vpop.permute.xlu1 %1404 }
 0x182   : > { %1640 = vmatmul.mubr.f32.gmra.mrb[70].mxu0 %v1307_v31  ;;  %1897 = vmatmul.mubr.f32.gmra.mrb[70].mxu1 %v1307_v31 }
 0x183   : > { %1645 = vmatprep.mubr.f32.mxu0 %v1310_v32  ;;  %1902 = vmatprep.mubr.f32.mxu1 %v1310_v32 }
 0x186   : > { %1646 = vmatmul.mubr.f32.gmra.mrb[72].mxu0 %v1309_v33  ;;  %1903 = vmatmul.mubr.f32.gmra.mrb[72].mxu1 %v1309_v33 }
 0x187   : > { %1651 = vmatprep.mubr.f32.mxu0 %v1312_v34  ;;  %1908 = vmatprep.mubr.f32.mxu1 %v1312_v34 }
 0x18a   : > { %1652 = vmatmul.mubr.f32.gmra.mrb[74].mxu0 %v1311_v35  ;;  %1909 = vmatmul.mubr.f32.gmra.mrb[74].mxu1 %v1311_v35 }
 0x18b   : > { %1657 = vmatprep.mubr.f32.mxu0 %v1314_v36  ;;  %1914 = vmatprep.mubr.f32.mxu1 %v1314_v36 }
 0x18e   : > { %1658 = vmatmul.mubr.f32.gmra.mrb[76].mxu0 %v1313_v37  ;;  %1915 = vmatmul.mubr.f32.gmra.mrb[76].mxu1 %v1313_v37 }
 0x18f   : > { %1663 = vmatprep.mubr.f32.mxu0 %v1316_v38  ;;  %1920 = vmatprep.mubr.f32.mxu1 %v1316_v38 }
 0x192   : > { %1664 = vmatmul.mubr.f32.gmra.mrb[78].mxu0 %v1315_v39  ;;  %1921 = vmatmul.mubr.f32.gmra.mrb[78].mxu1 %v1315_v39 }
 0x193   : > { %1669 = vmatprep.mubr.f32.mxu0 %v1318_v40  ;;  %1926 = vmatprep.mubr.f32.mxu1 %v1318_v40 }
 0x196   : > { %1670 = vmatmul.mubr.f32.gmra.mrb[80].mxu0 %v1317_v41  ;;  %1927 = vmatmul.mubr.f32.gmra.mrb[80].mxu1 %v1317_v41  ;;  %v2200_v41 = vld [vmem:[%s4071_s5 + $0x8] sm:$0xff] }
 0x197   : > { %1675 = vmatprep.mubr.f32.mxu0 %v1320_v42  ;;  %1932 = vmatprep.mubr.f32.mxu1 %v1320_v42 }
 0x19a   : > { %1676 = vmatmul.mubr.f32.gmra.mrb[82].mxu0 %v1319_v43  ;;  %1933 = vmatmul.mubr.f32.gmra.mrb[82].mxu1 %v1319_v43 }
 0x19b   : > { %1681 = vmatprep.mubr.f32.mxu0 %v1322_v44  ;;  %1938 = vmatprep.mubr.f32.mxu1 %v1322_v44 }
 0x19e   : > { %1682 = vmatmul.mubr.f32.gmra.mrb[84].mxu0 %v1321_v45  ;;  %1939 = vmatmul.mubr.f32.gmra.mrb[84].mxu1 %v1321_v45 }
 0x19f   : > { %1687 = vmatprep.mubr.f32.mxu0 %v1324_v46  ;;  %1944 = vmatprep.mubr.f32.mxu1 %v1324_v46 }
 0x1a2   : > { %1688 = vmatmul.mubr.f32.gmra.mrb[86].mxu0 %v1323_v47  ;;  %1945 = vmatmul.mubr.f32.gmra.mrb[86].mxu1 %v1323_v47 }
 0x1a3   : > { %1693 = vmatprep.mubr.f32.mxu0 %v1326_v48  ;;  %1950 = vmatprep.mubr.f32.mxu1 %v1326_v48 }
 0x1a6   : > { %1694 = vmatmul.mubr.f32.gmra.mrb[88].mxu0 %v1325_v49  ;;  %1951 = vmatmul.mubr.f32.gmra.mrb[88].mxu1 %v1325_v49 }
 0x1a7   : > { %1699 = vmatprep.mubr.f32.mxu0 %v1328_v50  ;;  %1956 = vmatprep.mubr.f32.mxu1 %v1328_v50 }
 0x1aa   : > { %1700 = vmatmul.mubr.f32.gmra.mrb[90].mxu0 %v1327_v51  ;;  %1957 = vmatmul.mubr.f32.gmra.mrb[90].mxu1 %v1327_v51 }
 0x1ab   : > { %1705 = vmatprep.mubr.f32.mxu0 %v1330_v52  ;;  %1962 = vmatprep.mubr.f32.mxu1 %v1330_v52 }
 0x1ae   : > { %1706 = vmatmul.mubr.f32.gmra.mrb[92].mxu0 %v1329_v53  ;;  %1963 = vmatmul.mubr.f32.gmra.mrb[92].mxu1 %v1329_v53 }
 0x1af   : > { %1711 = vmatprep.mubr.f32.mxu0 %v1332_v54  ;;  %1968 = vmatprep.mubr.f32.mxu1 %v1332_v54 }
 0x1b2   : > { %1712 = vmatmul.mubr.f32.gmra.mrb[94].mxu0 %v1331_v55  ;;  %1969 = vmatmul.mubr.f32.gmra.mrb[94].mxu1 %v1331_v55 }
 0x1b3   : > { %1717 = vmatprep.mubr.f32.mxu0 %v1334_v56  ;;  %1974 = vmatprep.mubr.f32.mxu1 %v1334_v56 }
 0x1b6   : > { %1718 = vmatmul.mubr.f32.gmra.mrb[96].mxu0 %v1333_v57  ;;  %1975 = vmatmul.mubr.f32.gmra.mrb[96].mxu1 %v1333_v57 }
 0x1b7   : > { %1723 = vmatprep.mubr.f32.mxu0 %v1336_v58  ;;  %1980 = vmatprep.mubr.f32.mxu1 %v1336_v58  ;;  %v1410_v58 = vpop.permute.xlu0 %1409 }
 0x1ba   : > { %1724 = vmatmul.mubr.f32.gmra.mrb[98].mxu0 %v1335_v59  ;;  %1981 = vmatmul.mubr.f32.gmra.mrb[98].mxu1 %v1335_v59 }
 0x1bb   : > { %1729 = vmatprep.mubr.f32.mxu0 %v1338_v60  ;;  %1986 = vmatprep.mubr.f32.mxu1 %v1338_v60 }
 0x1be   : > { %1730 = vmatmul.mubr.f32.gmra.mrb[100].mxu0 %v1337_v61  ;;  %1987 = vmatmul.mubr.f32.gmra.mrb[100].mxu1 %v1337_v61  ;;  %v1415_v61 = vpop.permute.xlu1 %1414 }
 0x1bf   : > { %1735 = vmatprep.mubr.f32.mxu0 %v1340_v62  ;;  %1992 = vmatprep.mubr.f32.mxu1 %v1340_v62 }
 0x1c2   : > { %1736 = vmatmul.mubr.f32.gmra.mrb[102].mxu0 %v1339_v63  ;;  %1993 = vmatmul.mubr.f32.gmra.mrb[102].mxu1 %v1339_v63 }
 0x1c3   : > { %1741 = vmatprep.mubr.f32.mxu0 %v1342_v0  ;;  %1998 = vmatprep.mubr.f32.mxu1 %v1342_v0 }
 0x1c6   : > { %1742 = vmatmul.mubr.f32.gmra.mrb[104].mxu0 %v1341_v1  ;;  %1999 = vmatmul.mubr.f32.gmra.mrb[104].mxu1 %v1341_v1 }
 0x1c7   : > { %1747 = vmatprep.mubr.f32.mxu0 %v1344_v2  ;;  %2004 = vmatprep.mubr.f32.mxu1 %v1344_v2 }
 0x1ca   : > { %1748 = vmatmul.mubr.f32.gmra.mrb[106].mxu0 %v1343_v3  ;;  %2005 = vmatmul.mubr.f32.gmra.mrb[106].mxu1 %v1343_v3 }
 0x1cb   : > { %1753 = vmatprep.mubr.f32.mxu0 %v1346_v4  ;;  %2010 = vmatprep.mubr.f32.mxu1 %v1346_v4 }
 0x1ce   : > { %1754 = vmatmul.mubr.f32.gmra.mrb[108].mxu0 %v1345_v6  ;;  %2011 = vmatmul.mubr.f32.gmra.mrb[108].mxu1 %v1345_v6 }
 0x1cf   : > { %1759 = vmatprep.mubr.f32.mxu0 %v1348_v7  ;;  %2016 = vmatprep.mubr.f32.mxu1 %v1348_v7 }
 0x1d2   : > { %1760 = vmatmul.mubr.f32.gmra.mrb[110].mxu0 %v1347_v8  ;;  %2017 = vmatmul.mubr.f32.gmra.mrb[110].mxu1 %v1347_v8 }
 0x1d3   : > { %1765 = vmatprep.mubr.f32.mxu0 %v1350_v9  ;;  %2022 = vmatprep.mubr.f32.mxu1 %v1350_v9 }
 0x1d6   : > { %1766 = vmatmul.mubr.f32.gmra.mrb[112].mxu0 %v1349_v10  ;;  %2023 = vmatmul.mubr.f32.gmra.mrb[112].mxu1 %v1349_v10 }
 0x1d7   : > { %1771 = vmatprep.mubr.f32.mxu0 %v1352_v11  ;;  %2028 = vmatprep.mubr.f32.mxu1 %v1352_v11 }
 0x1da   : > { %1772 = vmatmul.mubr.f32.gmra.mrb[114].mxu0 %v1351_v12  ;;  %2029 = vmatmul.mubr.f32.gmra.mrb[114].mxu1 %v1351_v12 }
 0x1db   : > { %1777 = vmatprep.mubr.f32.mxu0 %v1354_v13  ;;  %2034 = vmatprep.mubr.f32.mxu1 %v1354_v13 }
 0x1de   : > { %1778 = vmatmul.mubr.f32.gmra.mrb[116].mxu0 %v1353_v14  ;;  %2035 = vmatmul.mubr.f32.gmra.mrb[116].mxu1 %v1353_v14 }
 0x1df   : > { %1783 = vmatprep.mubr.f32.mxu0 %v1356_v15  ;;  %2040 = vmatprep.mubr.f32.mxu1 %v1356_v15 }
 0x1e2   : > { %1784 = vmatmul.mubr.f32.gmra.mrb[118].mxu0 %v1355_v16  ;;  %2041 = vmatmul.mubr.f32.gmra.mrb[118].mxu1 %v1355_v16 }
 0x1e3   : > { %1789 = vmatprep.mubr.f32.mxu0 %v1358_v17  ;;  %2046 = vmatprep.mubr.f32.mxu1 %v1358_v17 }
 0x1e6   : > { %1790 = vmatmul.mubr.f32.gmra.mrb[120].mxu0 %v1357_v18  ;;  %2047 = vmatmul.mubr.f32.gmra.mrb[120].mxu1 %v1357_v18 }
 0x1e7   : > { %1795 = vmatprep.mubr.f32.mxu0 %v1360_v19  ;;  %2052 = vmatprep.mubr.f32.mxu1 %v1360_v19 }
 0x1ea   : > { %1796 = vmatmul.mubr.f32.gmra.mrb[122].mxu0 %v1359_v20  ;;  %2053 = vmatmul.mubr.f32.gmra.mrb[122].mxu1 %v1359_v20 }
 0x1eb   : > { %1801 = vmatprep.mubr.f32.mxu0 %v1362_v21  ;;  %2058 = vmatprep.mubr.f32.mxu1 %v1362_v21 }
 0x1ee   : > { %1802 = vmatmul.mubr.f32.gmra.mrb[124].mxu0 %v1361_v22  ;;  %2059 = vmatmul.mubr.f32.gmra.mrb[124].mxu1 %v1361_v22 }
 0x1ef   : > { %1807 = vmatprep.mubr.f32.mxu0 %v1364_v23  ;;  %2064 = vmatprep.mubr.f32.mxu1 %v1364_v23 }
 0x1f2   : > { %1808 = vmatmul.mubr.f32.gmra.mrb[126].mxu0 %v1363_v24  ;;  %2065 = vmatmul.mubr.f32.gmra.mrb[126].mxu1 %v1363_v24 }
 0x1f3   : > { %2327 = vmatprep.mubr.f32.mxu0 %v2200_v41  ;;  %2440 = vmatprep.mubr.f32.mxu1 %v2200_v41 }
 0x249   : > { %v1623_v25 = vpop.f32.mrb[64].mxu0  ;;  %v1880_v26 = vpop.f32.mrb[64].mxu1 }
 0x24a   : > { %v1625_v27 = vpop.f32.mrb[65].mxu0  ;;  %v1882_v28 = vpop.f32.mrb[65].mxu1  ;;  %v1624_v31 = vadd.f32 %v1623_v25, %v1400_v29  ;;  %v1881_v32 = vadd.f32 %v1880_v26, %v1400_v29 }
 0x24b   : > { %v1626_v33 = vadd.f32 %v1625_v27, %v1400_v29  ;;  %v1883_v34 = vadd.f32 %v1882_v28, %v1400_v29  ;;  %v1420_v25 = vpop.permute.xlu0 %1419  ;;  %v1425_v28 = vpop.permute.xlu1 %1424 }
 0x24c   : > { %v2071_v44 = vmax.f32 %v1624_v31, 0.0  ;;  %v2073_v45 = vmax.f32 %v1881_v32, 0.0 }
 0x24d   : > { %v1629_v35 = vpop.f32.mrb[66].mxu0  ;;  %v1886_v36 = vpop.f32.mrb[66].mxu1  ;;  %v2072_v48 = vmax.f32 %v1626_v33, 0.0  ;;  %v2074_v49 = vmax.f32 %v1883_v34, 0.0 }
 0x24e   : > { %v1630_v37 = vadd.f32 %v1629_v35, %v1405_v30  ;;  %v1887_v38 = vadd.f32 %v1886_v36, %v1405_v30  ;;  %v1631_v39 = vpop.f32.mrb[67].mxu0  ;;  %v1888_v40 = vpop.f32.mrb[67].mxu1 }
 0x24f   : > { %v1632_v42 = vadd.f32 %v1631_v39, %v1405_v30  ;;  %v1889_v43 = vadd.f32 %v1888_v40, %v1405_v30 }
 0x250   : > { %v2075_v46 = vmax.f32 %v1630_v37, 0.0  ;;  %v2077_v47 = vmax.f32 %v1887_v38, 0.0 }
 0x251   : > { %v2076_v50 = vmax.f32 %v1632_v42, 0.0  ;;  %v2078_v51 = vmax.f32 %v1889_v43, 0.0  ;;  %v1635_v52 = vpop.f32.mrb[68].mxu0  ;;  %v1892_v53 = vpop.f32.mrb[68].mxu1 }
 0x252   : > { %v2961_v54 = vpack.c.bf16 %v2075_v46, %v2071_v44  ;;  %v3025_v55 = vpack.c.bf16 %v2077_v47, %v2073_v45  ;;  %v1637_v56 = vpop.f32.mrb[69].mxu0  ;;  %v1894_v57 = vpop.f32.mrb[69].mxu1  ;;  %v1636_v62 = vadd.f32 %v1635_v52, %v1410_v58  ;;  %v1893_v63 = vadd.f32 %v1892_v53, %v1410_v58 }
 0x253   : > { %v2959_v59 = vpack.c.bf16 %v2076_v50, %v2072_v48  ;;  %v3023_v60 = vpack.c.bf16 %v2078_v51, %v2074_v49  ;;  %v1638_v0 = vadd.f32 %v1637_v56, %v1410_v58  ;;  %v1895_v1 = vadd.f32 %v1894_v57, %v1410_v58  ;;  %v1435_v58 = vpop.permute.xlu1 %1434 }
 0x254   : > { %v2079_v11 = vmax.f32 %v1636_v62, 0.0  ;;  %v2081_v12 = vmax.f32 %v1893_v63, 0.0 }
 0x255   : > { %v1641_v2 = vpop.f32.mrb[70].mxu0  ;;  %v1898_v3 = vpop.f32.mrb[70].mxu1  ;;  %2960 = vmatprep.subr.bf16.mxu0 %v2959_v59  ;;  %3024 = vmatprep.subr.bf16.mxu1 %v3023_v60  ;;  %v2080_v15 = vmax.f32 %v1638_v0, 0.0  ;;  %v2082_v16 = vmax.f32 %v1895_v1, 0.0 }
 0x256   : > { %v1642_v4 = vadd.f32 %v1641_v2, %v1415_v61  ;;  %v1899_v6 = vadd.f32 %v1898_v3, %v1415_v61  ;;  %v1643_v7 = vpop.f32.mrb[71].mxu0  ;;  %v1900_v8 = vpop.f32.mrb[71].mxu1  ;;  %2962 = vmatpush1.bf16.msra.mxu0 %v2961_v54  ;;  %3026 = vmatpush1.bf16.msra.mxu1 %v3025_v55 }
 0x257   : > { %v1644_v9 = vadd.f32 %v1643_v7, %v1415_v61  ;;  %v1901_v10 = vadd.f32 %v1900_v8, %v1415_v61  ;;  %v1430_v55 = vpop.permute.xlu0 %1429 }
 0x258   : > { %v2083_v13 = vmax.f32 %v1642_v4, 0.0  ;;  %v2085_v14 = vmax.f32 %v1899_v6, 0.0 }
 0x259   : > { %v2084_v17 = vmax.f32 %v1644_v9, 0.0  ;;  %v2086_v18 = vmax.f32 %v1901_v10, 0.0  ;;  %v1647_v19 = vpop.f32.mrb[72].mxu0  ;;  %v1904_v20 = vpop.f32.mrb[72].mxu1 }
 0x25a   : > { %v2965_v21 = vpack.c.bf16 %v2083_v13, %v2079_v11  ;;  %v3029_v22 = vpack.c.bf16 %v2085_v14, %v2081_v12  ;;  %v1649_v23 = vpop.f32.mrb[73].mxu0  ;;  %v1906_v24 = vpop.f32.mrb[73].mxu1  ;;  %v1648_v29 = vadd.f32 %v1647_v19, %v1420_v25  ;;  %v1905_v30 = vadd.f32 %v1904_v20, %v1420_v25 }
 0x25b   : > { %v2963_v26 = vpack.c.bf16 %v2084_v17, %v2080_v15  ;;  %v3027_v27 = vpack.c.bf16 %v2086_v18, %v2082_v16  ;;  %v1650_v31 = vadd.f32 %v1649_v23, %v1420_v25  ;;  %v1907_v32 = vadd.f32 %v1906_v24, %v1420_v25  ;;  %v1445_v25 = vpop.permute.xlu1 %1444 }
 0x25c   : > { %v2087_v41 = vmax.f32 %v1648_v29, 0.0  ;;  %v2089_v42 = vmax.f32 %v1905_v30, 0.0 }
 0x25d   : > { %v1653_v33 = vpop.f32.mrb[74].mxu0  ;;  %v1910_v34 = vpop.f32.mrb[74].mxu1  ;;  %2964 = vmatprep.subr.bf16.mxu0 %v2963_v26  ;;  %3028 = vmatprep.subr.bf16.mxu1 %v3027_v27  ;;  %v2088_v45 = vmax.f32 %v1650_v31, 0.0  ;;  %v2090_v46 = vmax.f32 %v1907_v32, 0.0 }
 0x25e   : > { %v1654_v35 = vadd.f32 %v1653_v33, %v1425_v28  ;;  %v1911_v36 = vadd.f32 %v1910_v34, %v1425_v28  ;;  %v1655_v37 = vpop.f32.mrb[75].mxu0  ;;  %v1912_v38 = vpop.f32.mrb[75].mxu1  ;;  %2966 = vmatpush1.bf16.msra.mxu0 %v2965_v21  ;;  %3030 = vmatpush1.bf16.msra.mxu1 %v3029_v22 }
 0x25f   : > { %v1656_v39 = vadd.f32 %v1655_v37, %v1425_v28  ;;  %v1913_v40 = vadd.f32 %v1912_v38, %v1425_v28  ;;  %v1440_v22 = vpop.permute.xlu0 %1439 }
 0x260   : > { %v2091_v43 = vmax.f32 %v1654_v35, 0.0  ;;  %v2093_v44 = vmax.f32 %v1911_v36, 0.0 }
 0x261   : > { %v2092_v47 = vmax.f32 %v1656_v39, 0.0  ;;  %v2094_v48 = vmax.f32 %v1913_v40, 0.0  ;;  %v1659_v49 = vpop.f32.mrb[76].mxu0  ;;  %v1916_v50 = vpop.f32.mrb[76].mxu1 }
 0x262   : > { %v2969_v51 = vpack.c.bf16 %v2091_v43, %v2087_v41  ;;  %v3033_v52 = vpack.c.bf16 %v2093_v44, %v2089_v42  ;;  %v1661_v53 = vpop.f32.mrb[77].mxu0  ;;  %v1918_v54 = vpop.f32.mrb[77].mxu1  ;;  %v1660_v59 = vadd.f32 %v1659_v49, %v1430_v55  ;;  %v1917_v60 = vadd.f32 %v1916_v50, %v1430_v55 }
 0x263   : > { %v2967_v56 = vpack.c.bf16 %v2092_v47, %v2088_v45  ;;  %v3031_v57 = vpack.c.bf16 %v2094_v48, %v2090_v46  ;;  %v1662_v61 = vadd.f32 %v1661_v53, %v1430_v55  ;;  %v1919_v62 = vadd.f32 %v1918_v54, %v1430_v55  ;;  %v1455_v55 = vpop.permute.xlu1 %1454 }
 0x264   : > { %v2095_v8 = vmax.f32 %v1660_v59, 0.0  ;;  %v2097_v9 = vmax.f32 %v1917_v60, 0.0 }
 0x265   : > { %v1665_v63 = vpop.f32.mrb[78].mxu0  ;;  %v1922_v0 = vpop.f32.mrb[78].mxu1  ;;  %2968 = vmatprep.subr.bf16.mxu0 %v2967_v56  ;;  %3032 = vmatprep.subr.bf16.mxu1 %v3031_v57  ;;  %v2096_v12 = vmax.f32 %v1662_v61, 0.0  ;;  %v2098_v13 = vmax.f32 %v1919_v62, 0.0 }
 0x266   : > { %v1666_v1 = vadd.f32 %v1665_v63, %v1435_v58  ;;  %v1923_v2 = vadd.f32 %v1922_v0, %v1435_v58  ;;  %v1667_v3 = vpop.f32.mrb[79].mxu0  ;;  %v1924_v4 = vpop.f32.mrb[79].mxu1  ;;  %2970 = vmatpush1.bf16.msra.mxu0 %v2969_v51  ;;  %3034 = vmatpush1.bf16.msra.mxu1 %v3033_v52 }
 0x267   : > { %v1668_v6 = vadd.f32 %v1667_v3, %v1435_v58  ;;  %v1925_v7 = vadd.f32 %v1924_v4, %v1435_v58  ;;  %v1450_v52 = vpop.permute.xlu0 %1449 }
 0x268   : > { %v2099_v10 = vmax.f32 %v1666_v1, 0.0  ;;  %v2101_v11 = vmax.f32 %v1923_v2, 0.0 }
 0x269   : > { %v2100_v14 = vmax.f32 %v1668_v6, 0.0  ;;  %v2102_v15 = vmax.f32 %v1925_v7, 0.0  ;;  %v1671_v16 = vpop.f32.mrb[80].mxu0  ;;  %v1928_v17 = vpop.f32.mrb[80].mxu1 }
 0x26a   : > { %v2973_v18 = vpack.c.bf16 %v2099_v10, %v2095_v8  ;;  %v3037_v19 = vpack.c.bf16 %v2101_v11, %v2097_v9  ;;  %v1673_v20 = vpop.f32.mrb[81].mxu0  ;;  %v1930_v21 = vpop.f32.mrb[81].mxu1  ;;  %v1672_v26 = vadd.f32 %v1671_v16, %v1440_v22  ;;  %v1929_v27 = vadd.f32 %v1928_v17, %v1440_v22 }
 0x26b   : > { %v2971_v23 = vpack.c.bf16 %v2100_v14, %v2096_v12  ;;  %v3035_v24 = vpack.c.bf16 %v2102_v15, %v2098_v13  ;;  %v1674_v28 = vadd.f32 %v1673_v20, %v1440_v22  ;;  %v1931_v29 = vadd.f32 %v1930_v21, %v1440_v22  ;;  %v1465_v22 = vpop.permute.xlu1 %1464 }
 0x26c   : > { %v2103_v38 = vmax.f32 %v1672_v26, 0.0  ;;  %v2105_v39 = vmax.f32 %v1929_v27, 0.0 }
 0x26d   : > { %v1677_v30 = vpop.f32.mrb[82].mxu0  ;;  %v1934_v31 = vpop.f32.mrb[82].mxu1  ;;  %2972 = vmatprep.subr.bf16.mxu0 %v2971_v23  ;;  %3036 = vmatprep.subr.bf16.mxu1 %v3035_v24  ;;  %v2104_v42 = vmax.f32 %v1674_v28, 0.0  ;;  %v2106_v43 = vmax.f32 %v1931_v29, 0.0 }
 0x26e   : > { %v1678_v32 = vadd.f32 %v1677_v30, %v1445_v25  ;;  %v1935_v33 = vadd.f32 %v1934_v31, %v1445_v25  ;;  %v1679_v34 = vpop.f32.mrb[83].mxu0  ;;  %v1936_v35 = vpop.f32.mrb[83].mxu1  ;;  %2974 = vmatpush1.bf16.msra.mxu0 %v2973_v18  ;;  %3038 = vmatpush1.bf16.msra.mxu1 %v3037_v19 }
 0x26f   : > { %v1680_v36 = vadd.f32 %v1679_v34, %v1445_v25  ;;  %v1937_v37 = vadd.f32 %v1936_v35, %v1445_v25  ;;  %v1460_v19 = vpop.permute.xlu0 %1459 }
 0x270   : > { %v2107_v40 = vmax.f32 %v1678_v32, 0.0  ;;  %v2109_v41 = vmax.f32 %v1935_v33, 0.0 }
 0x271   : > { %v2108_v44 = vmax.f32 %v1680_v36, 0.0  ;;  %v2110_v45 = vmax.f32 %v1937_v37, 0.0  ;;  %v1683_v46 = vpop.f32.mrb[84].mxu0  ;;  %v1940_v47 = vpop.f32.mrb[84].mxu1 }
 0x272   : > { %v2977_v48 = vpack.c.bf16 %v2107_v40, %v2103_v38  ;;  %v3041_v49 = vpack.c.bf16 %v2109_v41, %v2105_v39  ;;  %v1685_v50 = vpop.f32.mrb[85].mxu0  ;;  %v1942_v51 = vpop.f32.mrb[85].mxu1  ;;  %v1684_v56 = vadd.f32 %v1683_v46, %v1450_v52  ;;  %v1941_v57 = vadd.f32 %v1940_v47, %v1450_v52 }
 0x273   : > { %v2975_v53 = vpack.c.bf16 %v2108_v44, %v2104_v42  ;;  %v3039_v54 = vpack.c.bf16 %v2110_v45, %v2106_v43  ;;  %v1686_v58 = vadd.f32 %v1685_v50, %v1450_v52  ;;  %v1943_v59 = vadd.f32 %v1942_v51, %v1450_v52  ;;  %v1475_v52 = vpop.permute.xlu1 %1474 }
 0x274   : > { %v2111_v4 = vmax.f32 %v1684_v56, 0.0  ;;  %v2113_v6 = vmax.f32 %v1941_v57, 0.0 }
 0x275   : > { %v1689_v60 = vpop.f32.mrb[86].mxu0  ;;  %v1946_v61 = vpop.f32.mrb[86].mxu1  ;;  %2976 = vmatprep.subr.bf16.mxu0 %v2975_v53  ;;  %3040 = vmatprep.subr.bf16.mxu1 %v3039_v54  ;;  %v2112_v9 = vmax.f32 %v1686_v58, 0.0  ;;  %v2114_v10 = vmax.f32 %v1943_v59, 0.0 }
 0x276   : > { %v1690_v62 = vadd.f32 %v1689_v60, %v1455_v55  ;;  %v1947_v63 = vadd.f32 %v1946_v61, %v1455_v55  ;;  %v1691_v0 = vpop.f32.mrb[87].mxu0  ;;  %v1948_v1 = vpop.f32.mrb[87].mxu1  ;;  %2978 = vmatpush1.bf16.msra.mxu0 %v2977_v48  ;;  %3042 = vmatpush1.bf16.msra.mxu1 %v3041_v49 }
 0x277   : > { %v1692_v2 = vadd.f32 %v1691_v0, %v1455_v55  ;;  %v1949_v3 = vadd.f32 %v1948_v1, %v1455_v55  ;;  %v1470_v49 = vpop.permute.xlu0 %1469 }
 0x278   : > { %v2115_v7 = vmax.f32 %v1690_v62, 0.0  ;;  %v2117_v8 = vmax.f32 %v1947_v63, 0.0 }
 0x279   : > { %v2116_v11 = vmax.f32 %v1692_v2, 0.0  ;;  %v2118_v12 = vmax.f32 %v1949_v3, 0.0  ;;  %v1695_v13 = vpop.f32.mrb[88].mxu0  ;;  %v1952_v14 = vpop.f32.mrb[88].mxu1 }
 0x27a   : > { %v2981_v15 = vpack.c.bf16 %v2115_v7, %v2111_v4  ;;  %v3045_v16 = vpack.c.bf16 %v2117_v8, %v2113_v6  ;;  %v1697_v17 = vpop.f32.mrb[89].mxu0  ;;  %v1954_v18 = vpop.f32.mrb[89].mxu1  ;;  %v1696_v23 = vadd.f32 %v1695_v13, %v1460_v19  ;;  %v1953_v24 = vadd.f32 %v1952_v14, %v1460_v19 }
 0x27b   : > { %v2979_v20 = vpack.c.bf16 %v2116_v11, %v2112_v9  ;;  %v3043_v21 = vpack.c.bf16 %v2118_v12, %v2114_v10  ;;  %v1698_v25 = vadd.f32 %v1697_v17, %v1460_v19  ;;  %v1955_v26 = vadd.f32 %v1954_v18, %v1460_v19  ;;  %v1485_v19 = vpop.permute.xlu1 %1484 }
 0x27c   : > { %v2119_v35 = vmax.f32 %v1696_v23, 0.0  ;;  %v2121_v36 = vmax.f32 %v1953_v24, 0.0 }
 0x27d   : > { %v1701_v27 = vpop.f32.mrb[90].mxu0  ;;  %v1958_v28 = vpop.f32.mrb[90].mxu1  ;;  %2980 = vmatprep.subr.bf16.mxu0 %v2979_v20  ;;  %3044 = vmatprep.subr.bf16.mxu1 %v3043_v21  ;;  %v2120_v39 = vmax.f32 %v1698_v25, 0.0  ;;  %v2122_v40 = vmax.f32 %v1955_v26, 0.0 }
 0x27e   : > { %v1702_v29 = vadd.f32 %v1701_v27, %v1465_v22  ;;  %v1959_v30 = vadd.f32 %v1958_v28, %v1465_v22  ;;  %v1703_v31 = vpop.f32.mrb[91].mxu0  ;;  %v1960_v32 = vpop.f32.mrb[91].mxu1  ;;  %2982 = vmatpush1.bf16.msra.mxu0 %v2981_v15  ;;  %3046 = vmatpush1.bf16.msra.mxu1 %v3045_v16 }
 0x27f   : > { %v1704_v33 = vadd.f32 %v1703_v31, %v1465_v22  ;;  %v1961_v34 = vadd.f32 %v1960_v32, %v1465_v22  ;;  %v1480_v16 = vpop.permute.xlu0 %1479 }
 0x280   : > { %v2123_v37 = vmax.f32 %v1702_v29, 0.0  ;;  %v2125_v38 = vmax.f32 %v1959_v30, 0.0 }
 0x281   : > { %v2124_v41 = vmax.f32 %v1704_v33, 0.0  ;;  %v2126_v42 = vmax.f32 %v1961_v34, 0.0  ;;  %v1707_v43 = vpop.f32.mrb[92].mxu0  ;;  %v1964_v44 = vpop.f32.mrb[92].mxu1 }
 0x282   : > { %v2985_v45 = vpack.c.bf16 %v2123_v37, %v2119_v35  ;;  %v3049_v46 = vpack.c.bf16 %v2125_v38, %v2121_v36  ;;  %v1709_v47 = vpop.f32.mrb[93].mxu0  ;;  %v1966_v48 = vpop.f32.mrb[93].mxu1  ;;  %v1708_v53 = vadd.f32 %v1707_v43, %v1470_v49  ;;  %v1965_v54 = vadd.f32 %v1964_v44, %v1470_v49 }
 0x283   : > { %v2983_v50 = vpack.c.bf16 %v2124_v41, %v2120_v39  ;;  %v3047_v51 = vpack.c.bf16 %v2126_v42, %v2122_v40  ;;  %v1710_v55 = vadd.f32 %v1709_v47, %v1470_v49  ;;  %v1967_v56 = vadd.f32 %v1966_v48, %v1470_v49  ;;  %v1495_v49 = vpop.permute.xlu1 %1494 }
 0x284   : > { %v2127_v1 = vmax.f32 %v1708_v53, 0.0  ;;  %v2129_v2 = vmax.f32 %v1965_v54, 0.0 }
 0x285   : > { %v1713_v57 = vpop.f32.mrb[94].mxu0  ;;  %v1970_v58 = vpop.f32.mrb[94].mxu1  ;;  %2984 = vmatprep.subr.bf16.mxu0 %v2983_v50  ;;  %3048 = vmatprep.subr.bf16.mxu1 %v3047_v51  ;;  %v2128_v6 = vmax.f32 %v1710_v55, 0.0  ;;  %v2130_v7 = vmax.f32 %v1967_v56, 0.0 }
 0x286   : > { %v1714_v59 = vadd.f32 %v1713_v57, %v1475_v52  ;;  %v1971_v60 = vadd.f32 %v1970_v58, %v1475_v52  ;;  %v1715_v61 = vpop.f32.mrb[95].mxu0  ;;  %v1972_v62 = vpop.f32.mrb[95].mxu1  ;;  %2986 = vmatpush1.bf16.msra.mxu0 %v2985_v45  ;;  %3050 = vmatpush1.bf16.msra.mxu1 %v3049_v46 }
 0x287   : > { %v1716_v63 = vadd.f32 %v1715_v61, %v1475_v52  ;;  %v1973_v0 = vadd.f32 %v1972_v62, %v1475_v52  ;;  %v1490_v46 = vpop.permute.xlu0 %1489 }
 0x288   : > { %v2131_v3 = vmax.f32 %v1714_v59, 0.0  ;;  %v2133_v4 = vmax.f32 %v1971_v60, 0.0 }
 0x289   : > { %v2132_v8 = vmax.f32 %v1716_v63, 0.0  ;;  %v2134_v9 = vmax.f32 %v1973_v0, 0.0  ;;  %v1719_v10 = vpop.f32.mrb[96].mxu0  ;;  %v1976_v11 = vpop.f32.mrb[96].mxu1 }
 0x28a   : > { %v2989_v12 = vpack.c.bf16 %v2131_v3, %v2127_v1  ;;  %v3053_v13 = vpack.c.bf16 %v2133_v4, %v2129_v2  ;;  %v1721_v14 = vpop.f32.mrb[97].mxu0  ;;  %v1978_v15 = vpop.f32.mrb[97].mxu1  ;;  %v1720_v20 = vadd.f32 %v1719_v10, %v1480_v16  ;;  %v1977_v21 = vadd.f32 %v1976_v11, %v1480_v16 }
 0x28b   : > { %v2987_v17 = vpack.c.bf16 %v2132_v8, %v2128_v6  ;;  %v3051_v18 = vpack.c.bf16 %v2134_v9, %v2130_v7  ;;  %v1722_v22 = vadd.f32 %v1721_v14, %v1480_v16  ;;  %v1979_v23 = vadd.f32 %v1978_v15, %v1480_v16  ;;  %v1505_v16 = vpop.permute.xlu1 %1504 }
 0x28c   : > { %v2135_v32 = vmax.f32 %v1720_v20, 0.0  ;;  %v2137_v33 = vmax.f32 %v1977_v21, 0.0 }
 0x28d   : > { %v1725_v24 = vpop.f32.mrb[98].mxu0  ;;  %v1982_v25 = vpop.f32.mrb[98].mxu1  ;;  %2988 = vmatprep.subr.bf16.mxu0 %v2987_v17  ;;  %3052 = vmatprep.subr.bf16.mxu1 %v3051_v18  ;;  %v2136_v36 = vmax.f32 %v1722_v22, 0.0  ;;  %v2138_v37 = vmax.f32 %v1979_v23, 0.0 }
 0x28e   : > { %v1726_v26 = vadd.f32 %v1725_v24, %v1485_v19  ;;  %v1983_v27 = vadd.f32 %v1982_v25, %v1485_v19  ;;  %v1727_v28 = vpop.f32.mrb[99].mxu0  ;;  %v1984_v29 = vpop.f32.mrb[99].mxu1  ;;  %2990 = vmatpush1.bf16.msra.mxu0 %v2989_v12  ;;  %3054 = vmatpush1.bf16.msra.mxu1 %v3053_v13 }
 0x28f   : > { %v1728_v30 = vadd.f32 %v1727_v28, %v1485_v19  ;;  %v1985_v31 = vadd.f32 %v1984_v29, %v1485_v19  ;;  %v1500_v13 = vpop.permute.xlu0 %1499 }
 0x290   : > { %v2139_v34 = vmax.f32 %v1726_v26, 0.0  ;;  %v2141_v35 = vmax.f32 %v1983_v27, 0.0 }
 0x291   : > { %v2140_v38 = vmax.f32 %v1728_v30, 0.0  ;;  %v2142_v39 = vmax.f32 %v1985_v31, 0.0  ;;  %v1731_v40 = vpop.f32.mrb[100].mxu0  ;;  %v1988_v41 = vpop.f32.mrb[100].mxu1 }
 0x292   : > { %v2993_v42 = vpack.c.bf16 %v2139_v34, %v2135_v32  ;;  %v3057_v43 = vpack.c.bf16 %v2141_v35, %v2137_v33  ;;  %v1733_v44 = vpop.f32.mrb[101].mxu0  ;;  %v1990_v45 = vpop.f32.mrb[101].mxu1  ;;  %v1732_v50 = vadd.f32 %v1731_v40, %v1490_v46  ;;  %v1989_v51 = vadd.f32 %v1988_v41, %v1490_v46 }
 0x293   : > { %v2991_v47 = vpack.c.bf16 %v2140_v38, %v2136_v36  ;;  %v3055_v48 = vpack.c.bf16 %v2142_v39, %v2138_v37  ;;  %v1734_v52 = vadd.f32 %v1733_v44, %v1490_v46  ;;  %v1991_v53 = vadd.f32 %v1990_v45, %v1490_v46  ;;  %v1515_v46 = vpop.permute.xlu1 %1514 }
 0x294   : > { %v2143_v62 = vmax.f32 %v1732_v50, 0.0  ;;  %v2145_v63 = vmax.f32 %v1989_v51, 0.0 }
 0x295   : > { %v1737_v54 = vpop.f32.mrb[102].mxu0  ;;  %v1994_v55 = vpop.f32.mrb[102].mxu1  ;;  %2992 = vmatprep.subr.bf16.mxu0 %v2991_v47  ;;  %3056 = vmatprep.subr.bf16.mxu1 %v3055_v48  ;;  %v2144_v2 = vmax.f32 %v1734_v52, 0.0  ;;  %v2146_v3 = vmax.f32 %v1991_v53, 0.0 }
 0x296   : > { %v1738_v56 = vadd.f32 %v1737_v54, %v1495_v49  ;;  %v1995_v57 = vadd.f32 %v1994_v55, %v1495_v49  ;;  %v1739_v58 = vpop.f32.mrb[103].mxu0  ;;  %v1996_v59 = vpop.f32.mrb[103].mxu1  ;;  %2994 = vmatpush1.bf16.msra.mxu0 %v2993_v42  ;;  %3058 = vmatpush1.bf16.msra.mxu1 %v3057_v43 }
 0x297   : > { %v1740_v60 = vadd.f32 %v1739_v58, %v1495_v49  ;;  %v1997_v61 = vadd.f32 %v1996_v59, %v1495_v49  ;;  %v1510_v43 = vpop.permute.xlu0 %1509 }
 0x298   : > { %v2147_v0 = vmax.f32 %v1738_v56, 0.0  ;;  %v2149_v1 = vmax.f32 %v1995_v57, 0.0 }
 0x299   : > { %v2148_v4 = vmax.f32 %v1740_v60, 0.0  ;;  %v2150_v6 = vmax.f32 %v1997_v61, 0.0  ;;  %v1743_v7 = vpop.f32.mrb[104].mxu0  ;;  %v2000_v8 = vpop.f32.mrb[104].mxu1 }
 0x29a   : > { %v2997_v9 = vpack.c.bf16 %v2147_v0, %v2143_v62  ;;  %v3061_v10 = vpack.c.bf16 %v2149_v1, %v2145_v63  ;;  %v1745_v11 = vpop.f32.mrb[105].mxu0  ;;  %v2002_v12 = vpop.f32.mrb[105].mxu1  ;;  %v1744_v17 = vadd.f32 %v1743_v7, %v1500_v13  ;;  %v2001_v18 = vadd.f32 %v2000_v8, %v1500_v13 }
 0x29b   : > { %v2995_v14 = vpack.c.bf16 %v2148_v4, %v2144_v2  ;;  %v3059_v15 = vpack.c.bf16 %v2150_v6, %v2146_v3  ;;  %v1746_v19 = vadd.f32 %v1745_v11, %v1500_v13  ;;  %v2003_v20 = vadd.f32 %v2002_v12, %v1500_v13  ;;  %v1525_v13 = vpop.permute.xlu1 %1524 }
 0x29c   : > { %v2151_v29 = vmax.f32 %v1744_v17, 0.0  ;;  %v2153_v30 = vmax.f32 %v2001_v18, 0.0 }
 0x29d   : > { %v1749_v21 = vpop.f32.mrb[106].mxu0  ;;  %v2006_v22 = vpop.f32.mrb[106].mxu1  ;;  %2996 = vmatprep.subr.bf16.mxu0 %v2995_v14  ;;  %3060 = vmatprep.subr.bf16.mxu1 %v3059_v15  ;;  %v2152_v33 = vmax.f32 %v1746_v19, 0.0  ;;  %v2154_v34 = vmax.f32 %v2003_v20, 0.0 }
 0x29e   : > { %v1750_v23 = vadd.f32 %v1749_v21, %v1505_v16  ;;  %v2007_v24 = vadd.f32 %v2006_v22, %v1505_v16  ;;  %v1751_v25 = vpop.f32.mrb[107].mxu0  ;;  %v2008_v26 = vpop.f32.mrb[107].mxu1  ;;  %2998 = vmatpush1.bf16.msra.mxu0 %v2997_v9  ;;  %3062 = vmatpush1.bf16.msra.mxu1 %v3061_v10 }
 0x29f   : > { %v1752_v27 = vadd.f32 %v1751_v25, %v1505_v16  ;;  %v2009_v28 = vadd.f32 %v2008_v26, %v1505_v16  ;;  %v1520_v10 = vpop.permute.xlu0 %1519 }
 0x2a0   : > { %v2155_v31 = vmax.f32 %v1750_v23, 0.0  ;;  %v2157_v32 = vmax.f32 %v2007_v24, 0.0 }
 0x2a1   : > { %v2156_v35 = vmax.f32 %v1752_v27, 0.0  ;;  %v2158_v36 = vmax.f32 %v2009_v28, 0.0  ;;  %v1755_v37 = vpop.f32.mrb[108].mxu0  ;;  %v2012_v38 = vpop.f32.mrb[108].mxu1 }
 0x2a2   : > { %v3001_v39 = vpack.c.bf16 %v2155_v31, %v2151_v29  ;;  %v3065_v40 = vpack.c.bf16 %v2157_v32, %v2153_v30  ;;  %v1757_v41 = vpop.f32.mrb[109].mxu0  ;;  %v2014_v42 = vpop.f32.mrb[109].mxu1  ;;  %v1756_v47 = vadd.f32 %v1755_v37, %v1510_v43  ;;  %v2013_v48 = vadd.f32 %v2012_v38, %v1510_v43 }
 0x2a3   : > { %v2999_v44 = vpack.c.bf16 %v2156_v35, %v2152_v33  ;;  %v3063_v45 = vpack.c.bf16 %v2158_v36, %v2154_v34  ;;  %v1758_v49 = vadd.f32 %v1757_v41, %v1510_v43  ;;  %v2015_v50 = vadd.f32 %v2014_v42, %v1510_v43  ;;  %v1535_v43 = vpop.permute.xlu1 %1534 }
 0x2a4   : > { %v2159_v59 = vmax.f32 %v1756_v47, 0.0  ;;  %v2161_v60 = vmax.f32 %v2013_v48, 0.0 }
 0x2a5   : > { %v1761_v51 = vpop.f32.mrb[110].mxu0  ;;  %v2018_v52 = vpop.f32.mrb[110].mxu1  ;;  %3000 = vmatprep.subr.bf16.mxu0 %v2999_v44  ;;  %3064 = vmatprep.subr.bf16.mxu1 %v3063_v45  ;;  %v2160_v63 = vmax.f32 %v1758_v49, 0.0  ;;  %v2162_v0 = vmax.f32 %v2015_v50, 0.0 }
 0x2a6   : > { %v1762_v53 = vadd.f32 %v1761_v51, %v1515_v46  ;;  %v2019_v54 = vadd.f32 %v2018_v52, %v1515_v46  ;;  %v1763_v55 = vpop.f32.mrb[111].mxu0  ;;  %v2020_v56 = vpop.f32.mrb[111].mxu1  ;;  %3002 = vmatpush1.bf16.msra.mxu0 %v3001_v39  ;;  %3066 = vmatpush1.bf16.msra.mxu1 %v3065_v40 }
 0x2a7   : > { %v1764_v57 = vadd.f32 %v1763_v55, %v1515_v46  ;;  %v2021_v58 = vadd.f32 %v2020_v56, %v1515_v46  ;;  %v1530_v40 = vpop.permute.xlu0 %1529 }
 0x2a8   : > { %v2163_v61 = vmax.f32 %v1762_v53, 0.0  ;;  %v2165_v62 = vmax.f32 %v2019_v54, 0.0 }
 0x2a9   : > { %v2164_v1 = vmax.f32 %v1764_v57, 0.0  ;;  %v2166_v2 = vmax.f32 %v2021_v58, 0.0  ;;  %v1767_v3 = vpop.f32.mrb[112].mxu0  ;;  %v2024_v4 = vpop.f32.mrb[112].mxu1 }
 0x2aa   : > { %v3005_v6 = vpack.c.bf16 %v2163_v61, %v2159_v59  ;;  %v3069_v7 = vpack.c.bf16 %v2165_v62, %v2161_v60  ;;  %v1769_v8 = vpop.f32.mrb[113].mxu0  ;;  %v2026_v9 = vpop.f32.mrb[113].mxu1  ;;  %v1768_v14 = vadd.f32 %v1767_v3, %v1520_v10  ;;  %v2025_v15 = vadd.f32 %v2024_v4, %v1520_v10 }
 0x2ab   : > { %v3003_v11 = vpack.c.bf16 %v2164_v1, %v2160_v63  ;;  %v3067_v12 = vpack.c.bf16 %v2166_v2, %v2162_v0  ;;  %v1770_v16 = vadd.f32 %v1769_v8, %v1520_v10  ;;  %v2027_v17 = vadd.f32 %v2026_v9, %v1520_v10  ;;  %v1545_v10 = vpop.permute.xlu1 %1544 }
 0x2ac   : > { %v2167_v26 = vmax.f32 %v1768_v14, 0.0  ;;  %v2169_v27 = vmax.f32 %v2025_v15, 0.0 }
 0x2ad   : > { %v1773_v18 = vpop.f32.mrb[114].mxu0  ;;  %v2030_v19 = vpop.f32.mrb[114].mxu1  ;;  %3004 = vmatprep.subr.bf16.mxu0 %v3003_v11  ;;  %3068 = vmatprep.subr.bf16.mxu1 %v3067_v12  ;;  %v2168_v30 = vmax.f32 %v1770_v16, 0.0  ;;  %v2170_v31 = vmax.f32 %v2027_v17, 0.0 }
 0x2ae   : > { %v1774_v20 = vadd.f32 %v1773_v18, %v1525_v13  ;;  %v2031_v21 = vadd.f32 %v2030_v19, %v1525_v13  ;;  %v1775_v22 = vpop.f32.mrb[115].mxu0  ;;  %v2032_v23 = vpop.f32.mrb[115].mxu1  ;;  %3006 = vmatpush1.bf16.msra.mxu0 %v3005_v6  ;;  %3070 = vmatpush1.bf16.msra.mxu1 %v3069_v7 }
 0x2af   : > { %v1776_v24 = vadd.f32 %v1775_v22, %v1525_v13  ;;  %v2033_v25 = vadd.f32 %v2032_v23, %v1525_v13  ;;  %v1540_v7 = vpop.permute.xlu0 %1539 }
 0x2b0   : > { %v2171_v28 = vmax.f32 %v1774_v20, 0.0  ;;  %v2173_v29 = vmax.f32 %v2031_v21, 0.0 }
 0x2b1   : > { %v2172_v32 = vmax.f32 %v1776_v24, 0.0  ;;  %v2174_v33 = vmax.f32 %v2033_v25, 0.0  ;;  %v1779_v34 = vpop.f32.mrb[116].mxu0  ;;  %v2036_v35 = vpop.f32.mrb[116].mxu1 }
 0x2b2   : > { %v3009_v36 = vpack.c.bf16 %v2171_v28, %v2167_v26  ;;  %v3073_v37 = vpack.c.bf16 %v2173_v29, %v2169_v27  ;;  %v1781_v38 = vpop.f32.mrb[117].mxu0  ;;  %v2038_v39 = vpop.f32.mrb[117].mxu1  ;;  %v1780_v44 = vadd.f32 %v1779_v34, %v1530_v40  ;;  %v2037_v45 = vadd.f32 %v2036_v35, %v1530_v40 }
 0x2b3   : > { %v3007_v41 = vpack.c.bf16 %v2172_v32, %v2168_v30  ;;  %v3071_v42 = vpack.c.bf16 %v2174_v33, %v2170_v31  ;;  %v1782_v46 = vadd.f32 %v1781_v38, %v1530_v40  ;;  %v2039_v47 = vadd.f32 %v2038_v39, %v1530_v40  ;;  %v1555_v40 = vpop.permute.xlu1 %1554 }
 0x2b4   : > { %v2175_v56 = vmax.f32 %v1780_v44, 0.0  ;;  %v2177_v57 = vmax.f32 %v2037_v45, 0.0 }
 0x2b5   : > { %v1785_v48 = vpop.f32.mrb[118].mxu0  ;;  %v2042_v49 = vpop.f32.mrb[118].mxu1  ;;  %3008 = vmatprep.subr.bf16.mxu0 %v3007_v41  ;;  %3072 = vmatprep.subr.bf16.mxu1 %v3071_v42  ;;  %v2176_v60 = vmax.f32 %v1782_v46, 0.0  ;;  %v2178_v61 = vmax.f32 %v2039_v47, 0.0 }
 0x2b6   : > { %v1786_v50 = vadd.f32 %v1785_v48, %v1535_v43  ;;  %v2043_v51 = vadd.f32 %v2042_v49, %v1535_v43  ;;  %v1787_v52 = vpop.f32.mrb[119].mxu0  ;;  %v2044_v53 = vpop.f32.mrb[119].mxu1  ;;  %3010 = vmatpush1.bf16.msra.mxu0 %v3009_v36  ;;  %3074 = vmatpush1.bf16.msra.mxu1 %v3073_v37 }
 0x2b7   : > { %v1788_v54 = vadd.f32 %v1787_v52, %v1535_v43  ;;  %v2045_v55 = vadd.f32 %v2044_v53, %v1535_v43  ;;  %v1550_v37 = vpop.permute.xlu0 %1549 }
 0x2b8   : > { %v2179_v58 = vmax.f32 %v1786_v50, 0.0  ;;  %v2181_v59 = vmax.f32 %v2043_v51, 0.0 }
 0x2b9   : > { %v2180_v62 = vmax.f32 %v1788_v54, 0.0  ;;  %v2182_v63 = vmax.f32 %v2045_v55, 0.0  ;;  %v1791_v0 = vpop.f32.mrb[120].mxu0  ;;  %v2048_v1 = vpop.f32.mrb[120].mxu1 }
 0x2ba   : > { %v3013_v2 = vpack.c.bf16 %v2179_v58, %v2175_v56  ;;  %v3077_v3 = vpack.c.bf16 %v2181_v59, %v2177_v57  ;;  %v1793_v4 = vpop.f32.mrb[121].mxu0  ;;  %v2050_v6 = vpop.f32.mrb[121].mxu1  ;;  %v1792_v11 = vadd.f32 %v1791_v0, %v1540_v7  ;;  %v2049_v12 = vadd.f32 %v2048_v1, %v1540_v7  ;;  %v2199_v1 = vld [vmem:[%s4071_s5] sm:$0xff] }
 0x2bb   : > { %v3011_v8 = vpack.c.bf16 %v2180_v62, %v2176_v60  ;;  %v3075_v9 = vpack.c.bf16 %v2182_v63, %v2178_v61  ;;  %v1794_v13 = vadd.f32 %v1793_v4, %v1540_v7  ;;  %v2051_v14 = vadd.f32 %v2050_v6, %v1540_v7  ;;  %v2204_v4 = vld [vmem:[%s4071_s5 + $0x28] sm:$0xff]  ;;  %v2203_v6 = vld [vmem:[%s4071_s5 + $0x20] sm:$0xff]  ;;  %v2206_v7 = vld [vmem:[%s4071_s5 + $0x38] sm:$0xff] }
 0x2bc   : > { %v2183_v23 = vmax.f32 %v1792_v11, 0.0  ;;  %v2185_v24 = vmax.f32 %v2049_v12, 0.0  ;;  %v2210_v11 = vld [vmem:[%s4071_s5 + $0x58] sm:$0xff]  ;;  %v2209_v12 = vld [vmem:[%s4071_s5 + $0x50] sm:$0xff] }
 0x2bd   : > { %v1797_v15 = vpop.f32.mrb[122].mxu0  ;;  %v2054_v16 = vpop.f32.mrb[122].mxu1  ;;  %3012 = vmatprep.subr.bf16.mxu0 %v3011_v8  ;;  %3076 = vmatprep.subr.bf16.mxu1 %v3075_v9  ;;  %v2184_v27 = vmax.f32 %v1794_v13, 0.0  ;;  %v2186_v28 = vmax.f32 %v2051_v14, 0.0  ;;  %v2205_v8 = vld [vmem:[%s4071_s5 + $0x30] sm:$0xff]  ;;  %v2208_v9 = vld [vmem:[%s4071_s5 + $0x48] sm:$0xff] }
 0x2be   : > { %v1798_v17 = vadd.f32 %v1797_v15, %v1545_v10  ;;  %v2055_v18 = vadd.f32 %v2054_v16, %v1545_v10  ;;  %v1799_v19 = vpop.f32.mrb[123].mxu0  ;;  %v2056_v20 = vpop.f32.mrb[123].mxu1  ;;  %3014 = vmatpush1.bf16.msra.mxu0 %v3013_v2  ;;  %3078 = vmatpush1.bf16.msra.mxu1 %v3077_v3  ;;  %v2202_v2 = vld [vmem:[%s4071_s5 + $0x18] sm:$0xff]  ;;  %v2201_v3 = vld [vmem:[%s4071_s5 + $0x10] sm:$0xff]  ;;  %v2212_v13 = vld [vmem:[%s4071_s5 + $0x68] sm:$0xff] }
 0x2bf   : > { %v1800_v21 = vadd.f32 %v1799_v19, %v1545_v10  ;;  %v2057_v22 = vadd.f32 %v2056_v20, %v1545_v10  ;;  %v2207_v10 = vld [vmem:[%s4071_s5 + $0x40] sm:$0xff]  ;;  %v2214_v15 = vld [vmem:[%s4071_s5 + $0x78] sm:$0xff]  ;;  %v2213_v16 = vld [vmem:[%s4071_s5 + $0x70] sm:$0xff] }
 0x2c0   : > { %v2187_v25 = vmax.f32 %v1798_v17, 0.0  ;;  %v2189_v26 = vmax.f32 %v2055_v18, 0.0  ;;  %v2211_v14 = vld [vmem:[%s4071_s5 + $0x60] sm:$0xff] }
 0x2c1   : > { %v2188_v29 = vmax.f32 %v1800_v21, 0.0  ;;  %v2190_v30 = vmax.f32 %v2057_v22, 0.0  ;;  %v1803_v31 = vpop.f32.mrb[124].mxu0  ;;  %v2060_v32 = vpop.f32.mrb[124].mxu1 }
 0x2c2   : > { %v3017_v33 = vpack.c.bf16 %v2187_v25, %v2183_v23  ;;  %v3081_v34 = vpack.c.bf16 %v2189_v26, %v2185_v24  ;;  %v1805_v35 = vpop.f32.mrb[125].mxu0  ;;  %v2062_v36 = vpop.f32.mrb[125].mxu1  ;;  %v1804_v41 = vadd.f32 %v1803_v31, %v1550_v37  ;;  %v2061_v42 = vadd.f32 %v2060_v32, %v1550_v37 }
 0x2c3   : > { %v3015_v38 = vpack.c.bf16 %v2188_v29, %v2184_v27  ;;  %v3079_v39 = vpack.c.bf16 %v2190_v30, %v2186_v28  ;;  %v1806_v43 = vadd.f32 %v1805_v35, %v1550_v37  ;;  %v2063_v44 = vadd.f32 %v2062_v36, %v1550_v37  ;;  %v2226_v21 = vpop.permute.xlu0 %2225  ;;  %v2231_v22 = vpop.permute.xlu1 %2230 }
 0x2c4   : > { %v2191_v53 = vmax.f32 %v1804_v41, 0.0  ;;  %v2193_v54 = vmax.f32 %v2061_v42, 0.0 }
 0x2c5   : > { %v1809_v45 = vpop.f32.mrb[126].mxu0  ;;  %v2066_v46 = vpop.f32.mrb[126].mxu1  ;;  %3016 = vmatprep.subr.bf16.mxu0 %v3015_v38  ;;  %3080 = vmatprep.subr.bf16.mxu1 %v3079_v39  ;;  %v2192_v57 = vmax.f32 %v1806_v43, 0.0  ;;  %v2194_v58 = vmax.f32 %v2063_v44, 0.0 }
 0x2c6   : > { %v1810_v47 = vadd.f32 %v1809_v45, %v1555_v40  ;;  %v2067_v48 = vadd.f32 %v2066_v46, %v1555_v40  ;;  %v1811_v49 = vpop.f32.mrb[127].mxu0  ;;  %v2068_v50 = vpop.f32.mrb[127].mxu1  ;;  %3018 = vmatpush1.bf16.msra.mxu0 %v3017_v33  ;;  %3082 = vmatpush1.bf16.msra.mxu1 %v3081_v34 }
 0x2c7   : > { %v1812_v51 = vadd.f32 %v1811_v49, %v1555_v40  ;;  %v2069_v52 = vadd.f32 %v2068_v50, %v1555_v40 }
 0x2c8   : > { %v2195_v55 = vmax.f32 %v1810_v47, 0.0  ;;  %v2197_v56 = vmax.f32 %v2067_v48, 0.0  ;;  %v2236_v48 = vpop.permute.xlu0 %2235 }
 0x2c9   : > { %v2196_v59 = vmax.f32 %v1812_v51, 0.0  ;;  %v2198_v60 = vmax.f32 %v2069_v52, 0.0  ;;  %v2241_v51 = vpop.permute.xlu1 %2240 }
 0x2ca   : > { %v3021_v61 = vpack.c.bf16 %v2195_v55, %v2191_v53  ;;  %v3085_v62 = vpack.c.bf16 %v2197_v56, %v2193_v54 }
 0x2cb   : > { %v3019_v63 = vpack.c.bf16 %v2196_v59, %v2192_v57  ;;  %v3083_v0 = vpack.c.bf16 %v2198_v60, %v2194_v58 }
 0x2cd   : > { %3020 = vmatprep.subr.bf16.mxu0 %v3019_v63  ;;  %3084 = vmatprep.subr.bf16.mxu1 %v3083_v0 }
 0x2ce   : > { %3022 = vmatpush1.bf16.msra.mxu0 %v3021_v61  ;;  %3086 = vmatpush1.bf16.msra.mxu1 %v3085_v62 }
 0x2d1   : > { %2328 = vmatmul.mubr.f32.vlgmr.msra.gmra.mrb[128].mxu0 %v2199_v1  ;;  %2441 = vmatmul.mubr.f32.vlgmr.msra.gmra.mrb[128].mxu1 %v2199_v1 }
 0x2d2   : > { %2333 = vmatprep.mubr.f32.mxu0 %v2202_v2  ;;  %2446 = vmatprep.mubr.f32.mxu1 %v2202_v2 }
 0x2d5   : > { %2334 = vmatmul.mubr.f32.gmra.mrb[130].mxu0 %v2201_v3  ;;  %2447 = vmatmul.mubr.f32.gmra.mrb[130].mxu1 %v2201_v3 }
 0x2d6   : > { %2339 = vmatprep.mubr.f32.mxu0 %v2204_v4  ;;  %2452 = vmatprep.mubr.f32.mxu1 %v2204_v4 }
 0x2d9   : > { %2340 = vmatmul.mubr.f32.gmra.mrb[132].mxu0 %v2203_v6  ;;  %2453 = vmatmul.mubr.f32.gmra.mrb[132].mxu1 %v2203_v6 }
 0x2da   : > { %2345 = vmatprep.mubr.f32.mxu0 %v2206_v7  ;;  %2458 = vmatprep.mubr.f32.mxu1 %v2206_v7 }
 0x2dd   : > { %2346 = vmatmul.mubr.f32.gmra.mrb[134].mxu0 %v2205_v8  ;;  %2459 = vmatmul.mubr.f32.gmra.mrb[134].mxu1 %v2205_v8 }
 0x2de   : > { %2351 = vmatprep.mubr.f32.mxu0 %v2208_v9  ;;  %2464 = vmatprep.mubr.f32.mxu1 %v2208_v9 }
 0x2e1   : > { %2352 = vmatmul.mubr.f32.gmra.mrb[136].mxu0 %v2207_v10  ;;  %2465 = vmatmul.mubr.f32.gmra.mrb[136].mxu1 %v2207_v10 }
 0x2e2   : > { %2357 = vmatprep.mubr.f32.mxu0 %v2210_v11  ;;  %2470 = vmatprep.mubr.f32.mxu1 %v2210_v11 }
 0x2e5   : > { %2358 = vmatmul.mubr.f32.gmra.mrb[138].mxu0 %v2209_v12  ;;  %2471 = vmatmul.mubr.f32.gmra.mrb[138].mxu1 %v2209_v12 }
 0x2e6   : > { %2363 = vmatprep.mubr.f32.mxu0 %v2212_v13  ;;  %2476 = vmatprep.mubr.f32.mxu1 %v2212_v13 }
 0x2e9   : > { %2364 = vmatmul.mubr.f32.gmra.mrb[140].mxu0 %v2211_v14  ;;  %2477 = vmatmul.mubr.f32.gmra.mrb[140].mxu1 %v2211_v14 }
 0x2ea   : > { %2369 = vmatprep.mubr.f32.mxu0 %v2214_v15  ;;  %2482 = vmatprep.mubr.f32.mxu1 %v2214_v15  ;;  %v2246_v15 = vpop.permute.xlu0 %2245 }
 0x2ed   : > { %2370 = vmatmul.mubr.f32.gmra.mrb[142].mxu0 %v2213_v16  ;;  %2483 = vmatmul.mubr.f32.gmra.mrb[142].mxu1 %v2213_v16 }
 0x2ee   : > { %2596 = vmatprep.mubr.f32.mxu0 %v3227_v5  ;;  %2667 = vmatprep.mubr.f32.mxu1 %v3227_v5 }
 0x3a4   : > { %v2329_v17 = vpop.f32.mrb[128].mxu0  ;;  %v2442_v18 = vpop.f32.mrb[128].mxu1 }
 0x3a5   : > { %v2331_v19 = vpop.f32.mrb[129].mxu0  ;;  %v2444_v20 = vpop.f32.mrb[129].mxu1  ;;  %v2330_v23 = vadd.f32 %v2329_v17, %v2226_v21  ;;  %v2443_v24 = vadd.f32 %v2442_v18, %v2226_v21 }
 0x3a6   : > { %v2332_v25 = vadd.f32 %v2331_v19, %v2226_v21  ;;  %v2445_v26 = vadd.f32 %v2444_v20, %v2226_v21  ;;  %v2251_v18 = vpop.permute.xlu1 %2250 }
 0x3a7   : > { %v2489_v35 = vmax.f32 %v2330_v23, 0.0  ;;  %v2491_v5 = vmax.f32 %v2443_v24, 0.0 }
 0x3a8   : > { %v2335_v27 = vpop.f32.mrb[130].mxu0  ;;  %v2448_v28 = vpop.f32.mrb[130].mxu1  ;;  %v2490_v38 = vmax.f32 %v2332_v25, 0.0  ;;  %v2492_v39 = vmax.f32 %v2445_v26, 0.0 }
 0x3a9   : > { %v2336_v29 = vadd.f32 %v2335_v27, %v2231_v22  ;;  %v2449_v30 = vadd.f32 %v2448_v28, %v2231_v22  ;;  %v2337_v31 = vpop.f32.mrb[131].mxu0  ;;  %v2450_v32 = vpop.f32.mrb[131].mxu1 }
 0x3aa   : > { %v2338_v33 = vadd.f32 %v2337_v31, %v2231_v22  ;;  %v2451_v34 = vadd.f32 %v2450_v32, %v2231_v22 }
 0x3ab   : > { %v2493_v36 = vmax.f32 %v2336_v29, 0.0  ;;  %v2495_v37 = vmax.f32 %v2449_v30, 0.0 }
 0x3ac   : > { %v2494_v40 = vmax.f32 %v2338_v33, 0.0  ;;  %v2496_v41 = vmax.f32 %v2451_v34, 0.0  ;;  %v2341_v42 = vpop.f32.mrb[132].mxu0  ;;  %v2454_v43 = vpop.f32.mrb[132].mxu1 }
 0x3ad   : > { %v3089_v44 = vpack.c.bf16 %v2493_v36, %v2489_v35  ;;  %v3105_v45 = vpack.c.bf16 %v2495_v37, %v2491_v5  ;;  %v2343_v46 = vpop.f32.mrb[133].mxu0  ;;  %v2456_v47 = vpop.f32.mrb[133].mxu1  ;;  %v2342_v52 = vadd.f32 %v2341_v42, %v2236_v48  ;;  %v2455_v53 = vadd.f32 %v2454_v43, %v2236_v48 }
 0x3ae   : > { %v3087_v49 = vpack.c.bf16 %v2494_v40, %v2490_v38  ;;  %v3103_v50 = vpack.c.bf16 %v2496_v41, %v2492_v39  ;;  %v2344_v54 = vadd.f32 %v2343_v46, %v2236_v48  ;;  %v2457_v55 = vadd.f32 %v2456_v47, %v2236_v48  ;;  %v2261_v47 = vpop.permute.xlu1 %2260 }
 0x3af   : > { %v2497_v0 = vmax.f32 %v2342_v52, 0.0  ;;  %v2499_v1 = vmax.f32 %v2455_v53, 0.0 }
 0x3b0   : > { %v2347_v56 = vpop.f32.mrb[134].mxu0  ;;  %v2460_v57 = vpop.f32.mrb[134].mxu1  ;;  %3088 = vmatprep.subr.bf16.mxu0 %v3087_v49  ;;  %3104 = vmatprep.subr.bf16.mxu1 %v3103_v50  ;;  %v2498_v4 = vmax.f32 %v2344_v54, 0.0  ;;  %v2500_v6 = vmax.f32 %v2457_v55, 0.0 }
 0x3b1   : > { %v2348_v58 = vadd.f32 %v2347_v56, %v2241_v51  ;;  %v2461_v59 = vadd.f32 %v2460_v57, %v2241_v51  ;;  %v2349_v60 = vpop.f32.mrb[135].mxu0  ;;  %v2462_v61 = vpop.f32.mrb[135].mxu1  ;;  %3090 = vmatpush1.bf16.msra.mxu0 %v3089_v44  ;;  %3106 = vmatpush1.bf16.msra.mxu1 %v3105_v45 }
 0x3b2   : > { %v2350_v62 = vadd.f32 %v2349_v60, %v2241_v51  ;;  %v2463_v63 = vadd.f32 %v2462_v61, %v2241_v51  ;;  %v2256_v44 = vpop.permute.xlu0 %2255 }
 0x3b3   : > { %v2501_v2 = vmax.f32 %v2348_v58, 0.0  ;;  %v2503_v3 = vmax.f32 %v2461_v59, 0.0 }
 0x3b4   : > { %v2502_v7 = vmax.f32 %v2350_v62, 0.0  ;;  %v2504_v8 = vmax.f32 %v2463_v63, 0.0  ;;  %v2353_v9 = vpop.f32.mrb[136].mxu0  ;;  %v2466_v10 = vpop.f32.mrb[136].mxu1 }
 0x3b5   : > { %v3093_v11 = vpack.c.bf16 %v2501_v2, %v2497_v0  ;;  %v3109_v12 = vpack.c.bf16 %v2503_v3, %v2499_v1  ;;  %v2355_v13 = vpop.f32.mrb[137].mxu0  ;;  %v2468_v14 = vpop.f32.mrb[137].mxu1  ;;  %v2354_v19 = vadd.f32 %v2353_v9, %v2246_v15  ;;  %v2467_v20 = vadd.f32 %v2466_v10, %v2246_v15  ;;  %v2521_v9 = vld [vmem:[%s4073_s7] sm:$0xff] }
 0x3b6   : > { %v3091_v16 = vpack.c.bf16 %v2502_v7, %v2498_v4  ;;  %v3107_v17 = vpack.c.bf16 %v2504_v8, %v2500_v6  ;;  %v2356_v21 = vadd.f32 %v2355_v13, %v2246_v15  ;;  %v2469_v22 = vadd.f32 %v2468_v14, %v2246_v15  ;;  %v2526_v10 = vpop.permute.xlu0 %2525 }
 0x3b7   : > { %v2505_v31 = vmax.f32 %v2354_v19, 0.0  ;;  %v2507_v32 = vmax.f32 %v2467_v20, 0.0 }
 0x3b8   : > { %v2359_v23 = vpop.f32.mrb[138].mxu0  ;;  %v2472_v24 = vpop.f32.mrb[138].mxu1  ;;  %3092 = vmatprep.subr.bf16.mxu0 %v3091_v16  ;;  %3108 = vmatprep.subr.bf16.mxu1 %v3107_v17  ;;  %v2506_v35 = vmax.f32 %v2356_v21, 0.0  ;;  %v2508_v5 = vmax.f32 %v2469_v22, 0.0 }
 0x3b9   : > { %v2360_v25 = vadd.f32 %v2359_v23, %v2251_v18  ;;  %v2473_v26 = vadd.f32 %v2472_v24, %v2251_v18  ;;  %v2361_v27 = vpop.f32.mrb[139].mxu0  ;;  %v2474_v28 = vpop.f32.mrb[139].mxu1  ;;  %3094 = vmatpush1.bf16.msra.mxu0 %v3093_v11  ;;  %3110 = vmatpush1.bf16.msra.mxu1 %v3109_v12 }
 0x3ba   : > { %v2362_v29 = vadd.f32 %v2361_v27, %v2251_v18  ;;  %v2475_v30 = vadd.f32 %v2474_v28, %v2251_v18 }
 0x3bb   : > { %v2509_v33 = vmax.f32 %v2360_v25, 0.0  ;;  %v2511_v34 = vmax.f32 %v2473_v26, 0.0 }
 0x3bc   : > { %v2510_v36 = vmax.f32 %v2362_v29, 0.0  ;;  %v2512_v37 = vmax.f32 %v2475_v30, 0.0  ;;  %v2365_v38 = vpop.f32.mrb[140].mxu0  ;;  %v2478_v39 = vpop.f32.mrb[140].mxu1 }
 0x3bd   : > { %v3097_v40 = vpack.c.bf16 %v2509_v33, %v2505_v31  ;;  %v3113_v41 = vpack.c.bf16 %v2511_v34, %v2507_v32  ;;  %v2367_v42 = vpop.f32.mrb[141].mxu0  ;;  %v2480_v43 = vpop.f32.mrb[141].mxu1  ;;  %v2366_v48 = vadd.f32 %v2365_v38, %v2256_v44  ;;  %v2479_v49 = vadd.f32 %v2478_v39, %v2256_v44 }
 0x3be   : > { %v3095_v45 = vpack.c.bf16 %v2510_v36, %v2506_v35  ;;  %v3111_v46 = vpack.c.bf16 %v2512_v37, %v2508_v5  ;;  %v2368_v50 = vadd.f32 %v2367_v42, %v2256_v44  ;;  %v2481_v51 = vadd.f32 %v2480_v43, %v2256_v44 }
 0x3bf   : > { %v2513_v60 = vmax.f32 %v2366_v48, 0.0  ;;  %v2515_v61 = vmax.f32 %v2479_v49, 0.0 }
 0x3c0   : > { %v2371_v52 = vpop.f32.mrb[142].mxu0  ;;  %v2484_v53 = vpop.f32.mrb[142].mxu1  ;;  %3096 = vmatprep.subr.bf16.mxu0 %v3095_v45  ;;  %3112 = vmatprep.subr.bf16.mxu1 %v3111_v46  ;;  %v2514_v0 = vmax.f32 %v2368_v50, 0.0  ;;  %v2516_v1 = vmax.f32 %v2481_v51, 0.0 }
 0x3c1   : > { %v2372_v54 = vadd.f32 %v2371_v52, %v2261_v47  ;;  %v2485_v55 = vadd.f32 %v2484_v53, %v2261_v47  ;;  %v2373_v56 = vpop.f32.mrb[143].mxu0  ;;  %v2486_v57 = vpop.f32.mrb[143].mxu1  ;;  %3098 = vmatpush1.bf16.msra.mxu0 %v3097_v40  ;;  %3114 = vmatpush1.bf16.msra.mxu1 %v3113_v41 }
 0x3c2   : > { %v2374_v58 = vadd.f32 %v2373_v56, %v2261_v47  ;;  %v2487_v59 = vadd.f32 %v2486_v57, %v2261_v47 }
 0x3c3   : > { %v2517_v62 = vmax.f32 %v2372_v54, 0.0  ;;  %v2519_v63 = vmax.f32 %v2485_v55, 0.0 }
 0x3c4   : > { %v2518_v2 = vmax.f32 %v2374_v58, 0.0  ;;  %v2520_v3 = vmax.f32 %v2487_v59, 0.0 }
 0x3c5   : > { %v3101_v4 = vpack.c.bf16 %v2517_v62, %v2513_v60  ;;  %v3117_v6 = vpack.c.bf16 %v2519_v63, %v2515_v61 }
 0x3c6   : > { %v3099_v7 = vpack.c.bf16 %v2518_v2, %v2514_v0  ;;  %v3115_v8 = vpack.c.bf16 %v2520_v3, %v2516_v1 }
 0x3c8   : > { %3100 = vmatprep.subr.bf16.mxu0 %v3099_v7  ;;  %3116 = vmatprep.subr.bf16.mxu1 %v3115_v8 }
 0x3c9   : > { %3102 = vmatpush1.bf16.msra.mxu0 %v3101_v4  ;;  %3118 = vmatpush1.bf16.msra.mxu1 %v3117_v6 }
 0x3cc   : > { %2823 = vmatmul.mubr.msk.f32.vlgmr.msra.gmra.mrb[144].mxu0 %vm2528_vm1, %v2521_v9  ;;  %2824 = vmatmul.mubr.msk.f32.vlgmr.msra.gmra.mrb[144].mxu1 %vm2528_vm1, %v2521_v9 }
 0x49f   : > { %v2598_v11 = vpop.f32.mrb[144].mxu0  ;;  %v2669_v12 = vpop.f32.mrb[144].mxu1 }
 0x4a0   : > { %v2599_v13 = vadd.f32 %v2598_v11, %v2526_v10  ;;  %v2670_v14 = vadd.f32 %v2669_v12, %v2526_v10  ;;  %v2600_v15 = vpop.f32.mrb[145].mxu0  ;;  %v2671_v16 = vpop.f32.mrb[145].mxu1 }
 0x4a1   : > { %v2601_v17 = vadd.f32 %v2600_v15, %v2526_v10  ;;  %v2672_v18 = vadd.f32 %v2671_v16, %v2526_v10 }
 0x4a2   : > { %2674 = vst [vmem:[%s326_s29] sm:$0xff] %v2599_v13  ;;  %2676 = vst [vmem:[%s326_s29 + $0x10] sm:$0xff] %v2670_v14 }
 0x4a3   : > { %2675 = vst [vmem:[%s326_s29 + $0x8] sm:$0xff] %v2601_v17  ;;  %2677 = vst [vmem:[%s326_s29 + $0x18] sm:$0xff] %v2672_v18 }
 0x4a4   : > { %3175 = shalt.err (!%p3172_p3)
}
 0x4a5   : > { %s3176_s25 = scalar_lea.hbm %s4024_s21, 512  ;;  %s3180_s29 = scalar_lea.hbm %s4075_s9, 1024 }
 0x4a6   : > { %p3177_p4 = scmp.ne.s32.totalorder %s4024_s21, %s3176_s25  ;;  %p3181_p9 = scmp.lt.u32.totalorder %s4024_s21, %s4075_s9 }
 0x4a7   : > { %p3182_p10 = scmp.lt.u32.totalorder %s3180_s29, %s3176_s25  ;;  %p3184_p12 = scmp.lt.u32.totalorder %s3176_s25, %s4024_s21 }
 0x4a8   : > { %p3178_p7 = pnand %p3177_p4, %p3317_p5 }
 0x4a9   : > { %p3183_p11 = por %p3182_p10, %p3181_p9 }
 0x4aa   : > { %p3179_p8 = pneg %p3178_p7 }
 0x4ab   : > { %p3185_p13 = por %p3184_p12, %p3183_p11 }
 0x4ad   : > { %p3186_p0 = pnand %p3185_p13, %p3179_p8 }
 0x4af   : > { %3189 = shalt.err (!%p3186_p0)
}
 0x4b0   : > { %3119 = dma.vmem_to_hbm [thread:$0]  (%p3317_p5), %s4026_s14, 512, %s4024_s21, %s2679_s13  }
 0x4b1 PF: > { %p3125_p1 = scmp.ge.s32.totalorder %s3224_s12, 2  ;;  %s2705_s22 = sand.u32 1, %s3212_s30  }
 0x4b2   : > { %s2706_s23 = scalar_lea.sflag [#allocation3], %s2705_s22 }
 0x4b3   : > { %p3122_p2 = pnand %p3125_p1, %p3321_p6 }
 0x4b5   : > { %3207 = dma.done.wait (!%p3122_p2), %s2706_s23, 512  }
 0x4b6   : > { %3209 = vsyncadd (!%p3122_p2), %s2706_s23, 4294966784  ;;  %p19_p3 = scmp.ge.s32.totalorder %s3304_s15, 4   ;;  %s4078_s30 = smov %s3216_s10 }
 0x4b7   : > { %s4079_s10 = smov %s3220_s11  ;;  %s4080_s11 = smov %s3315_s18 }
 0x4b8   : > { %s4081_s12 = smov %s3304_s15  ;;  %21 = sbr.rel (!%p19_p3) target bundleno = 3 (0x3), region = 91 }
 0x4bf   :  { %2711 = vsyncpa [#allocation3], 1 }
 0x4c0   :  { %2713 = vsyncpa [#allocation3 + $0x1], 1 }

</bundles_post_ra>
